<compile_context>
chip_gen: v5e
topology: v5e:2x2
jax: 0.10.0
libtpu: 0.0.40
codegen_flags: <defaults>
</compile_context>

<pallas_src>
import functools

import jax
import jax.numpy as jnp
from jax import lax
from jax.experimental import pallas as pl
from jax.experimental.pallas import tpu as pltpu


def _round_up(x, m):
    return (x + m - 1) // m * m


# ----------------------------------------------------------------------------
# Fused kernel: one-matmul 3x3 conv + ReLU + MXU GAP + fc + ReLU + dropout(0.5).
# ----------------------------------------------------------------------------
def encoder_kernel(seed_ref,      # SMEM (1,) int32     scalar-prefetch dropout seed
                   xflat_ref,     # VMEM (Bt, P+2, Cin) bf16  padded + flattened NHWC samples
                   mask_ref,      # VMEM (Bt, Bt*L) bf16      block-diag GAP weights (1/(H*W))
                   wconv_ref,     # VMEM (9*Cin, CF) bf16     conv taps, (kh,kw,c)-major rows
                   bconv_ref,     # VMEM (1, CF) f32
                   wfc_ref,       # VMEM (CF, E) bf16
                   bfc_ref,       # VMEM (1, E) f32
                   out_ref,       # VMEM (1, Bt, E) f32
                   *, h, w, bt):
    step = pl.program_id(0)
    wp2 = w + 2
    l_rows = h * wp2          # contiguous flattened row window covering all valid pixels
    q0 = w + 3                # flat index of the first interior (non-pad) pixel

    # --- 3x3 "same" conv as ONE (Bt*L, 9*Cin) x (9*Cin, CF) MXU matmul -------------
    # K operand assembled in VMEM from 9 shifted static slices of the resident slab
    # (no extra HBM traffic, no per-tap f32 add passes).
    xcats = []
    for b in range(bt):
        slabs = []
        for t in range(9):
            kh, kw = divmod(t, 3)
            start = q0 + (kh - 1) * wp2 + (kw - 1)
            slabs.append(xflat_ref[b, start:start + l_rows, :])
        xcats.append(jnp.concatenate(slabs, axis=-1))                    # (L, 9*Cin)
    xcat = xcats[0] if bt == 1 else jnp.concatenate(xcats, axis=0)       # (Bt*L, 9*Cin)

    acc = jnp.dot(xcat, wconv_ref[...], preferred_element_type=jnp.float32)
    act = jnp.maximum(acc + bconv_ref[...], 0.0)                         # (Bt*L, CF) f32

    # --- masked global-average-pool on the MXU --------------------------------------
    # mask_ref is block-diagonal and pre-scaled by 1/(H*W); pad-column rows get zero.
    pooled = jnp.dot(mask_ref[...], act.astype(jnp.bfloat16),
                     preferred_element_type=jnp.float32)                 # (Bt, CF) f32

    # --- replaced-fc head: Linear -> ReLU -> Dropout(0.5), fused per step -----------
    logits = jnp.dot(pooled.astype(jnp.bfloat16), wfc_ref[...],
                     preferred_element_type=jnp.float32) + bfc_ref[...]
    head = jnp.maximum(logits, 0.0)                                      # (Bt, E) f32

    # Counter-based hash PRNG (murmur3 finalizer), full-word threshold compare
    # => unbiased Bernoulli(0.5); portable (no pltpu.prng_* lowering dependency).
    e_pad = head.shape[1]
    rows = (lax.broadcasted_iota(jnp.int32, head.shape, 0)
            + step * bt).astype(jnp.uint32)                              # global sample idx
    cols = lax.broadcasted_iota(jnp.int32, head.shape, 1).astype(jnp.uint32)
    x = rows * jnp.uint32(e_pad) + cols
    x = x * jnp.uint32(0x9E3779B1) + seed_ref[0].astype(jnp.uint32)
    x = x ^ (x >> 16)
    x = x * jnp.uint32(0x85EBCA6B)
    x = x ^ (x >> 13)
    x = x * jnp.uint32(0xC2B2AE35)
    x = x ^ (x >> 16)
    keep = x >= jnp.uint32(0x80000000)                                   # p(keep) = 0.5
    out_ref[0, :, :] = jnp.where(keep, head * 2.0, 0.0).astype(out_ref.dtype)


# ----------------------------------------------------------------------------
# Wrapper / glue
# ----------------------------------------------------------------------------
@functools.partial(jax.jit, static_argnames=("embed_size", "batch_tile"))
def encoder_cnn_forward(images_nchw, params, dropout_seed, *, embed_size, batch_tile=8):
    """EncoderCNN.forward: images (N, C, H, W) -> (N, embed_size)."""
    n, c_in, h, w = images_nchw.shape
    c_feat = params["w_conv"].shape[-1]

    cf_pad = _round_up(c_feat, 128)          # lane-dense conv-out channels
    e_pad = _round_up(embed_size, 128)       # lane-dense embed dim

    # Samples per grid step: fold Bt*L into the matmul M dim, but keep >= 2 grid
    # steps when possible so the 'parallel' batch axis shards across v7x's 2 cores.
    bt = max(1, min(batch_tile, -(-n // 2)))
    n_steps = -(-n // bt)
    n_pad = n_steps * bt

    # NCHW -> NHWC, zero-pad spatially, flatten rows, +2 trailing rows, bf16.
    x = jnp.transpose(images_nchw, (0, 2, 3, 1))
    xp = jnp.pad(x, ((0, 0), (1, 1), (1, 1), (0, 0)))
    p_rows = (h + 2) * (w + 2)
    xflat = xp.reshape(n, p_rows, c_in)
    xflat = jnp.pad(xflat, ((0, n_pad - n), (0, 2), (0, 0))).astype(jnp.bfloat16)

    # Valid-pixel GAP weights for the L = H*(W+2) flattened conv rows, pre-scaled by
    # 1/(H*W) and laid out as a block-diagonal (Bt, Bt*L) matrix -> GAP runs on the MXU.
    l_rows = h * (w + 2)
    q = (w + 3) + jnp.arange(l_rows)
    ip = q // (w + 2)
    jp = q % (w + 2)
    valid = (jp >= 1) & (jp <= w) & (ip <= h)
    mask_row = valid.astype(jnp.float32) * (1.0 / (h * w))
    mask_blk = jnp.kron(jnp.eye(bt, dtype=jnp.float32),
                        mask_row[None, :]).astype(jnp.bfloat16)          # (Bt, Bt*L)

    # Conv weights as a single (9*Cin, CF) matrix -> one K=9*Cin MXU matmul per step.
    w_conv = params["w_conv"].reshape(9 * c_in, c_feat)
    w_conv = jnp.pad(w_conv, ((0, 0), (0, cf_pad - c_feat))).astype(jnp.bfloat16)
    b_conv = jnp.pad(params["b_conv"], ((0, 0), (0, cf_pad - c_feat))).astype(jnp.float32)
    w_fc = jnp.pad(params["w_fc"],
                   ((0, cf_pad - c_feat), (0, e_pad - embed_size))).astype(jnp.bfloat16)
    b_fc = jnp.pad(params["b_fc"], ((0, 0), (0, e_pad - embed_size))).astype(jnp.float32)

    kernel = functools.partial(encoder_kernel, h=h, w=w, bt=bt)
    out = pl.pallas_call(
        kernel,
        out_shape=jax.ShapeDtypeStruct((n_steps, bt, e_pad), jnp.float32),
        grid_spec=pltpu.PrefetchScalarGridSpec(
            num_scalar_prefetch=1,
            grid=(n_steps,),
            in_specs=[
                pl.BlockSpec((bt, p_rows + 2, c_in), lambda b, seed: (b, 0, 0)),
                pl.BlockSpec((bt, bt * l_rows), lambda b, seed: (0, 0)),
                pl.BlockSpec((9 * c_in, cf_pad), lambda b, seed: (0, 0)),
                pl.BlockSpec((1, cf_pad), lambda b, seed: (0, 0)),
                pl.BlockSpec((cf_pad, e_pad), lambda b, seed: (0, 0)),
                pl.BlockSpec((1, e_pad), lambda b, seed: (0, 0)),
            ],
            out_specs=pl.BlockSpec((1, bt, e_pad), lambda b, seed: (b, 0, 0)),
        ),
        compiler_params=pltpu.CompilerParams(
            # Each step writes its own output block and carries no state -> parallel.
            dimension_semantics=("parallel",),
            # Below v7x's 64 MiB physical VMEM; well above this kernel's footprint.
            vmem_limit_bytes=48 * 1024 * 1024,
        ),
    )(dropout_seed, xflat, mask_blk, w_conv, b_conv, w_fc, b_fc)

    return out.reshape(n_pad, e_pad)[:n, :embed_size]


def init_params(key, c_in, c_feat, embed_size):
    """Deterministic synthetic parameters (shapes implied by the module)."""
    k1, k2, k3, k4 = jax.random.split(key, 4)
    w_conv = jax.random.normal(k1, (3, 3, c_in, c_feat), jnp.float32) * 0.1
    b_conv = jax.random.normal(k2, (1, c_feat), jnp.float32) * 0.01
    w_fc = jax.random.normal(k3, (c_feat, embed_size), jnp.float32) * 0.1
    b_fc = jax.random.normal(k4, (1, embed_size), jnp.float32) * 0.01
    return {"w_conv": w_conv, "b_conv": b_conv, "w_fc": w_fc, "b_fc": b_fc}


def _reference_pre_dropout(images_nchw, params):
    """Pure-JAX f32 reference of conv+ReLU+GAP+fc+ReLU (pre-dropout)."""
    x = jnp.transpose(images_nchw, (0, 2, 3, 1))
    n, h, w, c = x.shape
    xp = jnp.pad(x, ((0, 0), (1, 1), (1, 1), (0, 0)))
    cols = []
    for kh in range(3):
        for kw in range(3):
            cols.append(xp[:, kh:kh + h, kw:kw + w, :])
    patches = jnp.stack(cols, axis=3).reshape(n, h * w, 9 * c)
    conv = patches @ params["w_conv"].reshape(9 * c, -1) + params["b_conv"]
    pooled = jnp.mean(jnp.maximum(conv, 0.0), axis=1)
    logits = pooled @ params["w_fc"] + params["b_fc"]
    return jnp.maximum(logits, 0.0)


if __name__ == "__main__":
    # Small shapes consistent with the forward pass:
    #   images (batch=2, channels=4, 16x16), synthetic feature width 64 (stand-in
    #   for Inception's 2048), embed_size=32.
    batch, c_in, hw, c_feat, embed_size = 2, 4, 16, 64, 32

    key = jax.random.PRNGKey(0)
    k_img, k_par = jax.random.split(key)
    images = jax.random.normal(k_img, (batch, c_in, hw, hw), jnp.float32)
    params = init_params(k_par, c_in, c_feat, embed_size)
    seed = jnp.array([0], dtype=jnp.int32)

    out = encoder_cnn_forward(images, params, seed, embed_size=embed_size)
    jax.block_until_ready(out)

    assert out.shape == (batch, embed_size)
    assert out.dtype == jnp.float32

    # Every element must be either dropped (0) or kept (2x the pre-dropout
    # activation), up to bf16 matmul tolerance.
    ref = _reference_pre_dropout(images, params)
    kept = jnp.abs(out - 2.0 * ref) <= (2e-2 + 1e-1 * jnp.abs(ref))
    dropped = jnp.abs(out) <= 2e-2
    assert bool(jnp.all(kept | dropped))

    print("KERNEL_OK")
</pallas_src>

<mosaic_0001>
module attributes {stable_mosaic.version = 11 : i64} {
  func.func @encoder_kernel(%arg0: i32, %arg1: memref<1xi32, #tpu.memory_space<smem>>, %arg2: memref<1x326x4xbf16, #tpu.memory_space<vmem>>, %arg3: memref<1x288xbf16, #tpu.memory_space<vmem>>, %arg4: memref<36x128xbf16, #tpu.memory_space<vmem>>, %arg5: memref<1x128xf32, #tpu.memory_space<vmem>>, %arg6: memref<128x128xbf16, #tpu.memory_space<vmem>>, %arg7: memref<1x128xf32, #tpu.memory_space<vmem>>, %arg8: memref<1x1x128xf32, #tpu.memory_space<vmem>>) attributes {dimension_semantics = [#tpu.dimension_semantics<parallel>], iteration_bounds = array<i64: 2>, scalar_prefetch = 1 : i64, scratch_operands = 0 : i64, tpu.core_type = #tpu.core_type<tc>, window_params = [{transform_indices = @transform_0, window_bounds = array<i64: 1, 326, 4>}, {pipeline_mode = #tpu.pipeline_mode<synchronous>, transform_indices = @transform_1, window_bounds = array<i64: 1, 288>}, {pipeline_mode = #tpu.pipeline_mode<synchronous>, transform_indices = @transform_2, window_bounds = array<i64: 36, 128>}, {pipeline_mode = #tpu.pipeline_mode<synchronous>, transform_indices = @transform_3, window_bounds = array<i64: 1, 128>}, {pipeline_mode = #tpu.pipeline_mode<synchronous>, transform_indices = @transform_4, window_bounds = array<i64: 128, 128>}, {pipeline_mode = #tpu.pipeline_mode<synchronous>, transform_indices = @transform_5, window_bounds = array<i64: 1, 128>}, {transform_indices = @transform_6, window_bounds = array<i64: 1, 1, 128>}]} {
    %c0 = arith.constant 0 : index
    %c0_0 = arith.constant 0 : index
    %c0_1 = arith.constant 0 : index
    %0 = vector.load %arg2[%c0, %c0_0, %c0_1] : memref<1x326x4xbf16, #tpu.memory_space<vmem>>, vector<1x288x4xbf16>
    %1 = vector.shape_cast %0 : vector<1x288x4xbf16> to vector<288x4xbf16>
    %c0_2 = arith.constant 0 : index
    %c1 = arith.constant 1 : index
    %c0_3 = arith.constant 0 : index
    %2 = vector.load %arg2[%c0_2, %c1, %c0_3] : memref<1x326x4xbf16, #tpu.memory_space<vmem>>, vector<1x288x4xbf16>
    %3 = vector.shape_cast %2 : vector<1x288x4xbf16> to vector<288x4xbf16>
    %c0_4 = arith.constant 0 : index
    %c2 = arith.constant 2 : index
    %c0_5 = arith.constant 0 : index
    %4 = vector.load %arg2[%c0_4, %c2, %c0_5] : memref<1x326x4xbf16, #tpu.memory_space<vmem>>, vector<1x288x4xbf16>
    %5 = vector.shape_cast %4 : vector<1x288x4xbf16> to vector<288x4xbf16>
    %c0_6 = arith.constant 0 : index
    %c18 = arith.constant 18 : index
    %c0_7 = arith.constant 0 : index
    %6 = vector.load %arg2[%c0_6, %c18, %c0_7] : memref<1x326x4xbf16, #tpu.memory_space<vmem>>, vector<1x288x4xbf16>
    %7 = vector.shape_cast %6 : vector<1x288x4xbf16> to vector<288x4xbf16>
    %c0_8 = arith.constant 0 : index
    %c19 = arith.constant 19 : index
    %c0_9 = arith.constant 0 : index
    %8 = vector.load %arg2[%c0_8, %c19, %c0_9] : memref<1x326x4xbf16, #tpu.memory_space<vmem>>, vector<1x288x4xbf16>
    %9 = vector.shape_cast %8 : vector<1x288x4xbf16> to vector<288x4xbf16>
    %c0_10 = arith.constant 0 : index
    %c20 = arith.constant 20 : index
    %c0_11 = arith.constant 0 : index
    %10 = vector.load %arg2[%c0_10, %c20, %c0_11] : memref<1x326x4xbf16, #tpu.memory_space<vmem>>, vector<1x288x4xbf16>
    %11 = vector.shape_cast %10 : vector<1x288x4xbf16> to vector<288x4xbf16>
    %c0_12 = arith.constant 0 : index
    %c36 = arith.constant 36 : index
    %c0_13 = arith.constant 0 : index
    %12 = vector.load %arg2[%c0_12, %c36, %c0_13] : memref<1x326x4xbf16, #tpu.memory_space<vmem>>, vector<1x288x4xbf16>
    %13 = vector.shape_cast %12 : vector<1x288x4xbf16> to vector<288x4xbf16>
    %c0_14 = arith.constant 0 : index
    %c37 = arith.constant 37 : index
    %c0_15 = arith.constant 0 : index
    %14 = vector.load %arg2[%c0_14, %c37, %c0_15] : memref<1x326x4xbf16, #tpu.memory_space<vmem>>, vector<1x288x4xbf16>
    %15 = vector.shape_cast %14 : vector<1x288x4xbf16> to vector<288x4xbf16>
    %c0_16 = arith.constant 0 : index
    %c38 = arith.constant 38 : index
    %c0_17 = arith.constant 0 : index
    %16 = vector.load %arg2[%c0_16, %c38, %c0_17] : memref<1x326x4xbf16, #tpu.memory_space<vmem>>, vector<1x288x4xbf16>
    %17 = vector.shape_cast %16 : vector<1x288x4xbf16> to vector<288x4xbf16>
    %18 = tpu.concatenate %1, %3, %5, %7, %9, %11, %13, %15, %17 in 1 : vector<288x4xbf16>, vector<288x4xbf16>, vector<288x4xbf16>, vector<288x4xbf16>, vector<288x4xbf16>, vector<288x4xbf16>, vector<288x4xbf16>, vector<288x4xbf16>, vector<288x4xbf16> -> vector<288x36xbf16>
    %c0_18 = arith.constant 0 : index
    %c0_19 = arith.constant 0 : index
    %19 = vector.load %arg4[%c0_18, %c0_19] : memref<36x128xbf16, #tpu.memory_space<vmem>>, vector<36x128xbf16>
    %cst = arith.constant dense<0.000000e+00> : vector<288x128xf32>
    %20 = tpu.matmul %18, %19, %cst {dimension_numbers = #tpu.dot_dimension_numbers<[1], [0], [0], [1], [0, 0, 1, 1], [], []>} : vector<288x36xbf16>, vector<36x128xbf16>, vector<288x128xf32> -> vector<288x128xf32>
    %c0_20 = arith.constant 0 : index
    %c0_21 = arith.constant 0 : index
    %21 = vector.load %arg5[%c0_20, %c0_21] : memref<1x128xf32, #tpu.memory_space<vmem>>, vector<1x128xf32>
    %22 = vector.broadcast %21 : vector<1x128xf32> to vector<288x128xf32>
    %23 = arith.addf %20, %22 : vector<288x128xf32>
    %cst_22 = arith.constant 0.000000e+00 : f32
    %24 = vector.broadcast %cst_22 : f32 to vector<288x128xf32>
    %25 = arith.maximumf %23, %24 : vector<288x128xf32>
    %c0_23 = arith.constant 0 : index
    %c0_24 = arith.constant 0 : index
    %26 = vector.load %arg3[%c0_23, %c0_24] : memref<1x288xbf16, #tpu.memory_space<vmem>>, vector<1x288xbf16>
    %27 = arith.truncf %25 : vector<288x128xf32> to vector<288x128xbf16>
    %cst_25 = arith.constant dense<0.000000e+00> : vector<1x128xf32>
    %28 = tpu.matmul %26, %27, %cst_25 {dimension_numbers = #tpu.dot_dimension_numbers<[1], [0], [0], [1], [0, 0, 1, 1], [], []>} : vector<1x288xbf16>, vector<288x128xbf16>, vector<1x128xf32> -> vector<1x128xf32>
    %29 = arith.truncf %28 : vector<1x128xf32> to vector<1x128xbf16>
    %c0_26 = arith.constant 0 : index
    %c0_27 = arith.constant 0 : index
    %30 = vector.load %arg6[%c0_26, %c0_27] : memref<128x128xbf16, #tpu.memory_space<vmem>>, vector<128x128xbf16>
    %cst_28 = arith.constant dense<0.000000e+00> : vector<1x128xf32>
    %31 = tpu.matmul %29, %30, %cst_28 {dimension_numbers = #tpu.dot_dimension_numbers<[1], [0], [0], [1], [0, 0, 1, 1], [], []>} : vector<1x128xbf16>, vector<128x128xbf16>, vector<1x128xf32> -> vector<1x128xf32>
    %c0_29 = arith.constant 0 : index
    %c0_30 = arith.constant 0 : index
    %32 = vector.load %arg7[%c0_29, %c0_30] : memref<1x128xf32, #tpu.memory_space<vmem>>, vector<1x128xf32>
    %33 = arith.addf %31, %32 : vector<1x128xf32>
    %cst_31 = arith.constant 0.000000e+00 : f32
    %34 = vector.broadcast %cst_31 : f32 to vector<1x128xf32>
    %35 = arith.maximumf %33, %34 : vector<1x128xf32>
    %36 = tpu.iota {dimensions = array<i32: 0>} : vector<1x128xi32>
    %c1_i32 = arith.constant 1 : i32
    %37 = arith.muli %arg0, %c1_i32 : i32
    %38 = vector.broadcast %37 : i32 to vector<1x128xi32>
    %39 = arith.addi %36, %38 : vector<1x128xi32>
    %40 = tpu.iota {dimensions = array<i32: 1>} : vector<1x128xi32>
    %c128_i32 = arith.constant 128 : i32
    %41 = vector.broadcast %c128_i32 : i32 to vector<1x128xi32>
    %42 = arith.muli %39, %41 : vector<1x128xi32>
    %43 = arith.addi %42, %40 : vector<1x128xi32>
    %c-1640531535_i32 = arith.constant -1640531535 : i32
    %44 = vector.broadcast %c-1640531535_i32 : i32 to vector<1x128xi32>
    %45 = arith.muli %43, %44 : vector<1x128xi32>
    %c0_32 = arith.constant 0 : index
    %46 = memref.load %arg1[%c0_32] : memref<1xi32, #tpu.memory_space<smem>>
    %47 = vector.broadcast %46 : i32 to vector<1x128xi32>
    %48 = arith.addi %45, %47 : vector<1x128xi32>
    %c16_i32 = arith.constant 16 : i32
    %49 = vector.broadcast %c16_i32 : i32 to vector<1x128xi32>
    %50 = arith.shrui %48, %49 : vector<1x128xi32>
    %51 = arith.xori %48, %50 : vector<1x128xi32>
    %c-2048144789_i32 = arith.constant -2048144789 : i32
    %52 = vector.broadcast %c-2048144789_i32 : i32 to vector<1x128xi32>
    %53 = arith.muli %51, %52 : vector<1x128xi32>
    %c13_i32 = arith.constant 13 : i32
    %54 = vector.broadcast %c13_i32 : i32 to vector<1x128xi32>
    %55 = arith.shrui %53, %54 : vector<1x128xi32>
    %56 = arith.xori %53, %55 : vector<1x128xi32>
    %c-1028477387_i32 = arith.constant -1028477387 : i32
    %57 = vector.broadcast %c-1028477387_i32 : i32 to vector<1x128xi32>
    %58 = arith.muli %56, %57 : vector<1x128xi32>
    %c16_i32_33 = arith.constant 16 : i32
    %59 = vector.broadcast %c16_i32_33 : i32 to vector<1x128xi32>
    %60 = arith.shrui %58, %59 : vector<1x128xi32>
    %61 = arith.xori %58, %60 : vector<1x128xi32>
    %c-2147483648_i32 = arith.constant -2147483648 : i32
    %62 = vector.broadcast %c-2147483648_i32 : i32 to vector<1x128xi32>
    %63 = arith.cmpi uge, %61, %62 : vector<1x128xi32>
    %cst_34 = arith.constant 2.000000e+00 : f32
    %64 = vector.broadcast %cst_34 : f32 to vector<1x128xf32>
    %65 = arith.mulf %35, %64 : vector<1x128xf32>
    %cst_35 = arith.constant 0.000000e+00 : f32
    %66 = vector.broadcast %cst_35 : f32 to vector<1x128xf32>
    %67 = arith.select %63, %65, %66 : vector<1x128xi1>, vector<1x128xf32>
    %c0_36 = arith.constant 0 : index
    %c0_37 = arith.constant 0 : index
    %c0_38 = arith.constant 0 : index
    %68 = vector.load %arg8[%c0_36, %c0_37, %c0_38] : memref<1x1x128xf32, #tpu.memory_space<vmem>>, vector<1x1x128xf32>
    %69 = vector.shape_cast %68 : vector<1x1x128xf32> to vector<1x128xf32>
    %70 = vector.shape_cast %67 : vector<1x128xf32> to vector<1x1x128xf32>
    tpu.vector_store %arg8[%c0_36, %c0_37, %c0_38], %70 {strides = array<i32>} : memref<1x1x128xf32, #tpu.memory_space<vmem>>, vector<1x1x128xf32>,
    return
  }
  func.func @transform_0(%arg0: i32, %arg1: memref<1xi32, #tpu.memory_space<smem>>) -> (i32, i32, i32) {
    %c0_i32 = arith.constant 0 : i32
    %c0_i32_0 = arith.constant 0 : i32
    %c0_i32_1 = arith.constant 0 : i32
    return %arg0, %c0_i32, %c0_i32_0 : i32, i32, i32
  }
  func.func @transform_1(%arg0: i32, %arg1: memref<1xi32, #tpu.memory_space<smem>>) -> (i32, i32) {
    %c0_i32 = arith.constant 0 : i32
    %c0_i32_0 = arith.constant 0 : i32
    %c0_i32_1 = arith.constant 0 : i32
    return %c0_i32, %c0_i32_0 : i32, i32
  }
  func.func @transform_2(%arg0: i32, %arg1: memref<1xi32, #tpu.memory_space<smem>>) -> (i32, i32) {
    %c0_i32 = arith.constant 0 : i32
    %c0_i32_0 = arith.constant 0 : i32
    %c0_i32_1 = arith.constant 0 : i32
    return %c0_i32, %c0_i32_0 : i32, i32
  }
  func.func @transform_3(%arg0: i32, %arg1: memref<1xi32, #tpu.memory_space<smem>>) -> (i32, i32) {
    %c0_i32 = arith.constant 0 : i32
    %c0_i32_0 = arith.constant 0 : i32
    %c0_i32_1 = arith.constant 0 : i32
    return %c0_i32, %c0_i32_0 : i32, i32
  }
  func.func @transform_4(%arg0: i32, %arg1: memref<1xi32, #tpu.memory_space<smem>>) -> (i32, i32) {
    %c0_i32 = arith.constant 0 : i32
    %c0_i32_0 = arith.constant 0 : i32
    %c0_i32_1 = arith.constant 0 : i32
    return %c0_i32, %c0_i32_0 : i32, i32
  }
  func.func @transform_5(%arg0: i32, %arg1: memref<1xi32, #tpu.memory_space<smem>>) -> (i32, i32) {
    %c0_i32 = arith.constant 0 : i32
    %c0_i32_0 = arith.constant 0 : i32
    %c0_i32_1 = arith.constant 0 : i32
    return %c0_i32, %c0_i32_0 : i32, i32
  }
  func.func @transform_6(%arg0: i32, %arg1: memref<1xi32, #tpu.memory_space<smem>>) -> (i32, i32, i32) {
    %c0_i32 = arith.constant 0 : i32
    %c0_i32_0 = arith.constant 0 : i32
    %c0_i32_1 = arith.constant 0 : i32
    return %arg0, %c0_i32, %c0_i32_0 : i32, i32, i32
  }
}

</mosaic_0001>

<bundles_post_ra>
// kernel: encoder_cnn_forward.1
= control target key start
LH: loop header
LB: loop body
LE: loop exit
PB: predicated region body
PF: predicated region fallthrough
CT: control target
= control target key end

     0   :  { %s3846_s0 = inlined_call_operand.<no memory space> [shape: s32[1], index: 0, kind: input, shape index: {}]   ;;  %s3847_s1 = inlined_call_operand.vmem [shape: bf16[2,326,4], index: 1, kind: input, shape index: {}]   ;;  %s3848_s2 = inlined_call_operand.vmem [shape: bf16[1,288], index: 2, kind: input, shape index: {}]   ;;  %s3849_s3 = inlined_call_operand.vmem [shape: bf16[36,128], index: 3, kind: input, shape index: {}]   ;;  %s3850_s4 = inlined_call_operand.vmem [shape: f32[1,128], index: 4, kind: input, shape index: {}]   ;;  %s3851_s5 = inlined_call_operand.vmem [shape: bf16[128,128], index: 5, kind: input, shape index: {}]   ;;  %s3852_s6 = inlined_call_operand.vmem [shape: f32[1,128], index: 6, kind: input, shape index: {}]   ;;  %s3853_s7 = inlined_call_operand.hbm [shape: f32[2,1,128], index: 7, kind: output, shape index: {}]  }
   0x1   :  { %12 = sst [smem:[#allocation3]] %s3846_s0 }
   0x2   :  { %13 = vsyncpa [#allocation5], 0 }
   0x3   :  { %15 = vsyncpa [#allocation5 + $0x1], 0  ;;  %s2280_s26 = smov 0   ;;  %s2282_s27 = smov 0  }
   0x4   :  { %s2284_s28 = smov 0   ;;  %s2286_s29 = smov 0  }
   0x5 LB: > { %s2301_s0 = sadd.s32 4294967295, %s2227_s29   ;;  %s1914_s30 = sadd.s32 4294967294, %s2227_s29   ;;  %s2227_s29 = sphi %s2286_s29, %s3986_s29   ;;  %s2223_s28 = sphi %s2284_s28, %s3985_s28   ;;  %s2219_s27 = sphi %s2282_s27, %s3984_s27   ;;  %s2215_s26 = sphi %s2280_s26, %s3983_s26  }
   0x6   : > { %s2305_s8 = sadd.s32 1, %s2227_s29   ;;  %s159_s9 = sadd.s32 1, %s2223_s28 }
   0x7   : > { %s156_s10 = ssub.s32 %s2227_s29, %s2305_s8  ;;  %p169_p0 = scmp.ne.s32.totalorder %s2223_s28, %s2219_s27 }
   0x8   : > { %p157_p1 = scmp.eq.s32.totalorder %s156_s10, 0  ;;  %p170_p2 = scmp.eq.s32.totalorder %s2301_s0, 1 }
   0x9   : > { %p175_p3 = scmp.ne.s32.totalorder %s2219_s27, %s2215_s26  ;;  %p176_p4 = scmp.eq.s32.totalorder %s1914_s30, 1 }
   0xa   : > { %s2316_s11 = scalar_select %p157_p1, %s2223_s28, %s159_s9  }
   0xb   : > { %p2318_p5 = por %p170_p2, %p169_p0  ;;  %p2322_p6 = por %p176_p4, %p175_p3 }
   0xc   : > { %p1917_p7 = scmp.ge.s32.totalorder %s2227_s29, 1  ;;  %p217_p8 = scmp.lt.s32.totalorder %s2227_s29, 3 }
   0xe   : > { %p218_p9 = pnand %p1917_p7, %p217_p8 }
  0x10   : > { %221 = sbr.rel (%p218_p9) target bundleno = 957 (0x3bd), region = 44 }
  0x15   : > { %p246_p10 = scmp.lt.s32.totalorder %s2301_s0, 1  ;;  %vm583_vm0 = vcmask 1046528   ;;  %vm843_vm1 = vcmask 1045504   ;;  %s2229_s19 = smov 12   ;;  %vm713_vm2 = vsmask.f32 6400 }
  0x16   : > { %s2230_s20 = smov 8   ;;  %s2231_s21 = smov 20   ;;  %vm395_vm3 = vsmask.f32 7424  ;;  %vm973_vm4 = vsmask.f32 5376 }
  0x17   : > { %s247_s14 = scalar_select %p246_p10, %s2301_s0, 1  ;;  %vm1103_vm5 = vcmask 1044480   ;;  %vm1534_vm6 = vcmask 1041408   ;;  %vm1177_vm7 = vcmask 31744   ;;  %vm1214_vm8 = vcmask 64512  }
  0x18   : > { %s2232_s22 = smov 24   ;;  %s2233_s23 = smov 4   ;;  %vm1288_vm9 = vcmask 130048   ;;  %vm1251_vm10 = vcmask 97280   ;;  %vm1325_vm11 = vcmask 162816   ;;  %vm1362_vm12 = vcmask 195584  }
  0x19   : > { %s2102_s15 = smul.u32 164, %s247_s14  ;;  %s2234_s24 = smov 16   ;;  %vm1399_vm13 = vcmask 228352   ;;  %vm1436_vm14 = vcmask 261120   ;;  %vm1497_vm15 = vcmask 293888  }
  0x1a   : > { %s2235_s25 = smov 28   ;;  %s2236_s30 = smov 32  }
  0x1b   : > { %s2333_s18 = scalar_lea.vmem %s3847_s1, %s2102_s15  ;;  %s1855_s14 = scalar_lea.hbm %s3853_s7, %s2301_s0 }
  0x1c   : > { %v2336_v0 = vld [vmem:[%s2333_s18 + $0x60] sm:$0xff]  ;;  %v2339_v1 = vld [vmem:[%s2333_s18 + $0x68] sm:$0xff]  ;;  %v2342_v2 = vld [vmem:[%s2333_s18 + $0x58] sm:$0xff]  ;;  %s1859_s17 = sshll.u32 %s1855_s14, 4  ;;  %s1860_s17 = int_to_ptr.hbm [resolvable:$true] %s1859_s17 }
  0x1d   : > { %3912 = vst [vmem:[#allocation7_spill] sm:$0xff] %v2339_v1  ;;  %v2345_v3 = vld [vmem:[%s2333_s18 + $0x70] sm:$0xff]  ;;  %v2090_v4 = vld [vmem:[%s2333_s18] sm:$0xf0]  ;;  %v607_v5 = vrot.slane %v2336_v0, 1  ;;  %v609_v6 = vrot.slane %v2339_v1, 1 }
  0x1e   : > { %v3858_v7 = vrot.slane %v2342_v2, 1  ;;  %v2091_v8 = vld [vmem:[%s2333_s18] sm:$0xe]  ;;  %v867_v9 = vrot.slane %v2339_v1, 2  ;;  %v2354_v10 = vld [vmem:[%s2333_s18 + $0x8] sm:$0xff]   ;;  %v3857_v12 = vrot.slane %v2336_v0, 2 }
  0x1f   : > { %v2092_v11 = vor.u32 %v2091_v8, %v2090_v4  ;;  %v2360_v13 = vsel %vm583_vm0, %v607_v5, %v609_v6  ;;  %v2368_v15 = vshll.u32 %v2336_v0, 16  ;;  %v2371_v16 = vshrl.u32 %v2336_v0, 16  ;;  %v2396_v24 = vld [vmem:[%s2333_s18] sm:$0xff]   ;;  %v290_v27 = vld [vmem:[%s2333_s18 + $0x8] sm:$0xe]  ;;  %v2408_v32 = vld [vmem:[%s2333_s18 + $0x10] sm:$0xff]  }
  0x20   : > { %v2365_v14 = vsel %vm583_vm0, %v3858_v7, %v607_v5  ;;  %696 = vrot.lane.b32.xlu1 %v2360_v13, %s2229_s19  ;;  %v869_v17 = vrot.slane %v2345_v3, 2  ;;  %v2381_v18 = vsel %vm843_vm1, %v3857_v12, %v867_v9  ;;  %v2384_v19 = vshll.u32 %v2339_v1, 16  ;;  %v296_v59 = vld [vmem:[%s2333_s18 + $0x10] sm:$0xc]  ;;  %s2179_s10 = sshra.s32 %s1860_s17, 4  ;;  %s2180_s10 = int_to_ptr.hbm [resolvable:$true] %s2179_s10 }
  0x21   : > { %3913 = vst [vmem:[#allocation8_spill] sm:$0xff] %v2365_v14  ;;  %643 = vrot.lane.b32.xlu0 %v2365_v14, %s2230_s20  ;;  %v584_v20 = vrot.slane %v2092_v11, 1  ;;  %v585_v21 = vrot.slane %v2354_v10, 1  ;;  %903 = vrot.lane.b32.xlu2 %v2381_v18, %s2231_s21  ;;  %v2390_v22 = vshrl.u32 %v2339_v1, 16  ;;  %v2393_v23 = vshll.u32 %v2342_v2, 16  ;;  %p2186_p0 = scmp.lt.s32.totalorder %s2180_s10, %s3853_s7 }
  0x22   : > { %3914 = vst [vmem:[#allocation9_spill] sm:$0xff] %v2368_v15  ;;  %v762_v25 = vrot.slane %v2371_v16, 1  ;;  %v763_v26 = vrot.slane %v2368_v15, 2  ;;  %v767_v29 = vrot.slane %v2384_v19, 2  ;;  %v2405_v31 = vshrl.u32 %v2342_v2, 16 }
  0x23   : > { %3915 = vst [vmem:[#allocation10_spill] sm:$0xff] %v2371_v16  ;;  %v766_v28 = vrot.slane %v2390_v22, 1  ;;  %v3855_v30 = vrot.slane %v2393_v23, 1  ;;  %v397_v33 = vshrl.u32 %v2396_v24, 16  ;;  %v399_v34 = vshll.u32 %v2396_v24, 16 }
  0x24   : > { %3916 = vst [vmem:[#allocation11_spill] sm:$0xff] %v2381_v18  ;;  %v404_v35 = vshll.u32 %v2354_v10, 16  ;;  %v2083_v36 = vunpack.c.h.b16 %v2354_v10  ;;  %v2417_v37 = vsel %vm843_vm1, %v867_v9, %v869_v17  ;;  %v586_v38 = vsel %vm583_vm0, %v584_v20, %v585_v21 }
  0x25   : > { %3917 = vst [vmem:[#allocation12_spill] sm:$0xff] %v2393_v23  ;;  %v494_v39 = vrot.slane %v2368_v15, 1  ;;  %v661_v40 = vunpack.c.l.b16 %v290_v27  ;;  %v2423_v41 = vor.u32 %v763_v26, %v762_v25  ;;  %v401_v42 = vrot.slane %v399_v34, 1  ;;  %v295_v25 = vld [vmem:[%s2333_s18 + $0x8] sm:$0xc] }
  0x26   : > { %v2425_v43 = vrot.slane %v404_v35, 1  ;;  %v412_v44 = vshll.u32 %v2408_v32, 16  ;;  %v2428_v45 = vor.u32 %v767_v29, %v766_v28  ;;  %v490_v46 = vor.u32 %v2405_v31, %v3855_v30  ;;  %v2479_v35 = vld [vmem:[%s2333_s18 + $0x18] sm:$0xff] }
  0x27   : > { %3918 = vst [vmem:[#allocation13_spill] sm:$0xff] %v2423_v41  ;;  %v3868_v47 = vshrl.u32 %v2408_v32, 16  ;;  %v665_v48 = vpack.c.b16 %v2083_v36, %v661_v40  ;;  %v402_v49 = vor.u32 %v401_v42, %v397_v33  ;;  %v2440_v52 = vshll.u32 %v2345_v3, 16 }
  0x28   : > { %956 = vrot.lane.b32.xlu1 %v2417_v37, %s2232_s22  ;;  %v2443_v53 = vshrl.u32 %v2345_v3, 16  ;;  %v769_v55 = vsel %vm713_vm2, %v2423_v41, %v2428_v45  ;;  %v495_v56 = vsel %vm395_vm3, %v490_v46, %v494_v39  ;;  %v723_v58 = vrot.slane %v412_v44, 2  ;;  %v2067_v41 = vld [vmem:[%s3849_s3 + $0x8] sm:$0xff] }
  0x29   : > { %621 = vrot.lane.b32.xlu0 %v586_v38, %s2230_s20  ;;  %v715_v50 = vshrl.u32 %v665_v48, 16  ;;  %v718_v51 = vshll.u32 %v665_v48, 16  ;;  %v407_v54 = vsel %vm395_vm3, %v402_v49, %v2425_v43  ;;  %v722_v57 = vrot.slane %v3868_v47, 1 }
  0x2a   : > { %544 = vrot.lane.b32.xlu2 %v407_v54, %s2233_s23  ;;  %v1022_v60 = vrot.slane %v2390_v22, 2  ;;  %v1023_v61 = vrot.slane %v2384_v19, 3  ;;  %v2462_v62 = vrot.slane %v2408_v32, 1  ;;  %v668_v63 = vrot.slane %v665_v48, 1 }
  0x2b   : > { %v717_v4 = vrot.slane %v715_v50, 1  ;;  %v720_v5 = vrot.slane %v718_v51, 2  ;;  %v1026_v8 = vrot.slane %v2443_v53, 2  ;;  %v1027_v9 = vrot.slane %v2440_v52, 3 }
  0x2c   : > { %v2087_v11 = vunpack.c.h.b16 %v2408_v32  ;;  %v921_v20 = vunpack.c.l.b16 %v296_v59  ;;  %v2470_v26 = vor.u32 %v723_v58, %v722_v57  ;;  %v669_v27 = vsel %vm583_vm0, %v668_v63, %v2462_v62 }
  0x2d   : > { %v721_v28 = vor.u32 %v720_v5, %v717_v4  ;;  %v2474_v29 = vor.u32 %v1023_v61, %v1022_v60  ;;  %v2476_v33 = vor.u32 %v1027_v9, %v1026_v8  ;;  %v841_v34 = vunpack.c.l.b16 %v295_v25 }
  0x2e   : > { %v925_v38 = vpack.c.b16 %v2087_v11, %v921_v20  ;;  %v3854_v40 = vrot.slane %v2339_v1, 3  ;;  %v1127_v42 = vrot.slane %v2345_v3, 3  ;;  %v2485_v46 = vshll.u32 %v2479_v35, 16 }
  0x2f   : > { %3919 = vst [vmem:[#allocation14_spill] sm:$0xff] %v2474_v29  ;;  %v2488_v48 = vshrl.u32 %v2479_v35, 16  ;;  %v725_v51 = vsel %vm713_vm2, %v721_v28, %v2470_v26  ;;  %v1029_v54 = vsel %vm973_vm4, %v2474_v29, %v2476_v33  ;;  %v2499_v57 = vrot.slane %v2479_v35, 2 }
  0x30   : > { %826 = vrot.lane.b32.xlu1 %v769_v55, %s2234_s24  ;;  %v975_v49 = vshrl.u32 %v925_v38, 16  ;;  %v978_v50 = vshll.u32 %v925_v38, 16  ;;  %v842_v55 = vpack.c.b16 %v2083_v36, %v841_v34  ;;  %v1128_v58 = vsel %vm1103_vm5, %v3854_v40, %v1127_v42 }
  0x31   : > { %566 = vrot.lane.b32.xlu0 %v495_v56, %s2233_s23  ;;  %v301_v56 = vld [vmem:[%s2333_s18 + $0x10] sm:$0x8]  ;;  %v982_v61 = vrot.slane %v2488_v48, 2  ;;  %v983_v36 = vrot.slane %v2485_v46, 3  ;;  %v928_v63 = vrot.slane %v925_v38, 2  ;;  %v845_v5 = vrot.slane %v2408_v32, 2 }
  0x32   : > { %674 = vrot.lane.b32.xlu2 %v669_v27, %s2229_s19  ;;  %v977_v59 = vrot.slane %v975_v49, 2  ;;  %v980_v60 = vrot.slane %v978_v50, 3  ;;  %v844_v4 = vrot.slane %v842_v55, 2  ;;  %v1101_v8 = vunpack.c.l.b16 %v301_v56 }
  0x33   : > { %v2512_v20 = vor.u32 %v983_v36, %v982_v61  ;;  %v929_v25 = vsel %vm843_vm1, %v928_v63, %v2499_v57  ;;  %v498_v38 = vor.u32 %v2371_v16, %v494_v39  ;;  %v502_v49 = vrot.slane %v2384_v19, 1 }
  0x34   : > { %v981_v9 = vor.u32 %v980_v60, %v977_v59  ;;  %v846_v27 = vsel %vm843_vm1, %v844_v4, %v845_v5  ;;  %v1102_v28 = vpack.c.b16 %v2087_v11, %v1101_v8  ;;  %v770_v55 = vrot.slane %v2443_v53, 1  ;;  %v2561_v4 = vld [vmem:[%s2333_s18 + $0x78] sm:$0xff] }
  0x35   : > { %v503_v11 = vsel %vm395_vm3, %v498_v38, %v502_v49  ;;  %v771_v39 = vrot.slane %v2440_v52, 2  ;;  %v408_v56 = vshrl.u32 %v2354_v10, 16  ;;  %v3865_v59 = vrot.slane %v2345_v3, 1  ;;  %v2602_v38 = vld [vmem:[%s2333_s18 + $0x20] sm:$0xff] }
  0x36   : > { %v985_v34 = vsel %vm973_vm4, %v981_v9, %v2512_v20  ;;  %v1104_v50 = vrot.slane %v1102_v28, 3  ;;  %v2548_v61 = vrot.slane %v412_v44, 1  ;;  %v2572_v44 = vshrl.u32 %v2561_v4, 16 }
  0x37   : > { %v410_v60 = vor.u32 %v408_v56, %v2425_v43  ;;  %v2558_v63 = vsel %vm583_vm0, %v609_v6, %v3865_v59  ;;  %v2569_v43 = vshll.u32 %v2561_v4, 16  ;;  %v3864_v6 = vrot.slane %v2561_v4, 2 }
  0x38   : > { %804 = vrot.lane.b32.xlu1 %v725_v51, %s2234_s24  ;;  %v1105_v51 = vrot.slane %v2479_v35, 3  ;;  %v1030_v8 = vrot.slane %v2572_v44, 2  ;;  %v3879_v47 = vrot.slane %v2440_v52, 1  ;;  %v3932_v16 = vrot.slane %v2561_v4, 3 }
  0x39   : > { %1086 = vrot.lane.b32.xlu0 %v1029_v54, %s2235_s25  ;;  %v1031_v9 = vrot.slane %v2569_v43, 3 }
  0x3a   : > { %1163 = vrot.lane.b32.xlu2 %v1128_v58, %s2236_s30  ;;  %v1106_v54 = vsel %vm1103_vm5, %v1104_v50, %v1105_v51  ;;  %v2540_v58 = vor.u32 %v771_v39, %v770_v55  ;;  %v2627_v39 = vshll.u32 %v2602_v38, 16 }
  0x3b   : > { %v2594_v28 = vor.u32 %v1031_v9, %v1030_v8 }
  0x3c   : > { %v773_v36 = vsel %vm713_vm2, %v2428_v45, %v2540_v58  ;;  %v588_v45 = vsel %vm583_vm0, %v585_v21, %v2462_v62  ;;  %v727_v21 = vrot.slane %v2485_v46, 2 }
  0x40   : > { %934 = vrot.lane.b32.xlu1 %v929_v25, %s2232_s22  ;;  %v2590_v25 = vsel %vm843_vm1, %v869_v17, %v3864_v6  ;;  %v1033_v17 = vsel %vm973_vm4, %v2476_v33, %v2594_v28  ;;  %v2624_v33 = vshrl.u32 %v2602_v38, 16 }
  0x41   : > { %881 = vrot.lane.b32.xlu0 %v846_v27, %s2231_s21  ;;  %v726_v27 = vrot.slane %v2488_v48, 1 }
  0x42   : > { %1064 = vrot.lane.b32.xlu2 %v985_v34, %s2235_s25  ;;  %v3863_v34 = vrot.slane %v2479_v35, 1  ;;  %3920 = vst [vmem:[#allocation15_spill] sm:$0xff] %v2624_v33 }
  0x44   : > { %v2611_v50 = vsel %vm583_vm0, %v2462_v62, %v3863_v34  ;;  %v2630_v62 = vld [vmem:[%s2333_s18 + $0x38] sm:$0xff] }
  0x45   : > { %3921 = vst [vmem:[#allocation16_spill] sm:$0xff] %v2630_v62  ;;  %v597_v30 = vrot.slane %v2630_v62, 1 }
  0x48   : > { %568 = vrot.lane.b32.xlu1 %v503_v11, %s2233_s23  ;;  %v2614_v11 = vld [vmem:[%s2333_s18 + $0x30] sm:$0xff] }
  0x49   : > { %1141 = vrot.lane.b32.xlu0 %v1106_v54, %s2236_s30  ;;  %v3862_v54 = vrot.slane %v2561_v4, 3  ;;  %v2633_v56 = vshll.u32 %v2614_v11, 16  ;;  %v2650_v9 = vshrl.u32 %v2614_v11, 16 }
  0x4a   : > { %645 = vrot.lane.b32.xlu2 %v2360_v13, %s2230_s20  ;;  %v415_v13 = vsel %vm395_vm3, %v410_v60, %v2548_v61  ;;  %v848_v60 = vsel %vm843_vm1, %v845_v5, %v2499_v57 }
  0x4b   : > { %v3856_v8 = vrot.slane %v2633_v56, 1 }
  0x50   : > { %828 = vrot.lane.b32.xlu1 %v773_v36, %s2234_s24  ;;  %v986_v36 = vrot.slane %v2624_v33, 2 }
  0x51   : > { %698 = vrot.lane.b32.xlu0 %v2558_v63, %s2229_s19 }
  0x52   : > { %546 = vrot.lane.b32.xlu2 %v415_v13, %s2233_s23  ;;  %v3859_v13 = vrot.slane %v2602_v38, 2 }
  0x58   : > { %623 = vrot.lane.b32.xlu1 %v588_v45, %s2230_s20  ;;  %v987_v45 = vrot.slane %v2627_v39, 3 }
  0x59   : > { %905 = vrot.lane.b32.xlu0 %v2417_v37, %s2231_s21  ;;  %v2599_v37 = vor.u32 %v727_v21, %v726_v27  ;;  %v2653_v27 = vshll.u32 %v2630_v62, 16  ;;  %v450_v21 = vor.u32 %v2650_v9, %v3856_v8 }
  0x5a   : > { %958 = vrot.lane.b32.xlu2 %v2590_v25, %s2232_s22  ;;  %v2663_v5 = vor.u32 %v987_v45, %v986_v36 }
  0x5b   : > { %v729_v55 = vsel %vm713_vm2, %v2470_v26, %v2599_v37  ;;  %v1130_v26 = vsel %vm1103_vm5, %v1127_v42, %v3862_v54  ;;  %v2661_v42 = vsel %vm843_vm1, %v2499_v57, %v3859_v13  ;;  %v743_v7 = vrot.slane %v2653_v27, 2 }
  0x5c   : > { %v989_v45 = vsel %vm973_vm4, %v2512_v20, %v2663_v5 }
  0x60   : > { %1088 = vrot.lane.b32.xlu1 %v1033_v17, %s2235_s25  ;;  %v3860_v17 = vrot.slane %v2653_v27, 1 }
  0x61   : > { %676 = vrot.lane.b32.xlu0 %v2611_v50, %s2229_s19 }
  0x62   : > { %806 = vrot.lane.b32.xlu2 %v729_v55, %s2234_s24  ;;  %v2670_v55 = vld [vmem:[%s2333_s18 + $0x40] sm:$0xff]  ;;  %v455_v40 = vsel %vm395_vm3, %v450_v21, %v3860_v17  ;;  %v3866_v17 = vrot.slane %v2602_v38, 3 }
  0x63   : > { %3922 = vst [vmem:[#allocation17_spill] sm:$0xff] %v2670_v55  ;;  %v2679_v57 = vshll.u32 %v2670_v55, 16  ;;  %v2682_v36 = vshrl.u32 %v2670_v55, 16  ;;  %v3867_v21 = vrot.slane %v2670_v55, 1  ;;  %v857_v6 = vrot.slane %v2670_v55, 2 }
  0x64   : > { %v1108_v34 = vsel %vm1103_vm5, %v1105_v51, %v3866_v17 }
  0x65   : > { %v746_v20 = vrot.slane %v2682_v36, 1  ;;  %v747_v13 = vrot.slane %v2679_v57, 2  ;;  %v2716_v54 = vsel %vm583_vm0, %v597_v30, %v3867_v21  ;;  %v1002_v17 = vrot.slane %v2682_v36, 2 }
  0x66   : > { %v506_v21 = vor.u32 %v2390_v22, %v502_v49 }
  0x68   : > { %883 = vrot.lane.b32.xlu1 %v848_v60, %s2231_s21  ;;  %v3861_v60 = vrot.slane %v2614_v11, 1  ;;  %v511_v19 = vsel %vm395_vm3, %v506_v21, %v3879_v47  ;;  %v775_v21 = vrot.slane %v2569_v43, 2  ;;  %v731_v47 = vrot.slane %v2627_v39, 2 }
  0x69   : > { %1165 = vrot.lane.b32.xlu0 %v1130_v26, %s2236_s30  ;;  %v2676_v26 = vshrl.u32 %v2630_v62, 16 }
  0x6a   : > { %936 = vrot.lane.b32.xlu2 %v2661_v42, %s2232_s22  ;;  %v2694_v8 = vsel %vm583_vm0, %v3861_v60, %v597_v30  ;;  %v2707_v60 = vld [vmem:[%s2333_s18 + $0x48] sm:$0xff] }
  0x6b   : > { %3923 = vst [vmem:[#allocation18_spill] sm:$0xff] %v2694_v8  ;;  %v742_v12 = vrot.slane %v2676_v26, 1  ;;  %v3869_v59 = vrot.slane %v2707_v60, 2  ;;  %v2733_v30 = vshll.u32 %v2707_v60, 16  ;;  %v2736_v51 = vshrl.u32 %v2707_v60, 16 }
  0x6d   : > { %v1006_v1 = vrot.slane %v2736_v51, 2  ;;  %v1007_v29 = vrot.slane %v2733_v30, 3 }
  0x6f   : > { %v2771_v49 = vor.u32 %v1007_v29, %v1006_v1 }
  0x70   : > { %1066 = vrot.lane.b32.xlu1 %v989_v45, %s2235_s25  ;;  %v2709_v45 = vor.u32 %v743_v7, %v742_v12  ;;  %v3872_v7 = vrot.slane %v2630_v62, 2 }
  0x71   : > { %556 = vrot.lane.b32.xlu0 %v455_v40, %s2233_s23  ;;  %v2711_v40 = vor.u32 %v747_v13, %v746_v20  ;;  %v2741_v13 = vsel %vm843_vm1, %v857_v6, %v3869_v59  ;;  %v1477_v59 = vld [vmem:[%s3849_s3 + $0x10] sm:$0x3] }
  0x72   : > { %633 = vrot.lane.b32.xlu2 %v2694_v8, %s2230_s20  ;;  %3924 = vst [vmem:[#allocation19_spill] sm:$0xff] %v2709_v45  ;;  %v2749_v20 = vsel %vm843_vm1, %v3872_v7, %v857_v6  ;;  %v1491_v6 = vunpack.c.l.b16 %v1477_v59  ;;  %v3875_v59 = vrot.slane %v2670_v55, 3 }
  0x73   : > { %v749_v12 = vsel %vm713_vm2, %v2709_v45, %v2711_v40  ;;  %3925 = vst [vmem:[#allocation20_spill] sm:$0xff] %v2749_v20  ;;  %v2869_v45 = vld [vmem:[%s2333_s18 + $0x28] sm:$0xff] }
  0x74   : > { %v1494_v7 = vpack.c.b16 %v1491_v6, %v1491_v6  ;;  %v3876_v6 = vrot.slane %v2707_v60, 3 }
  0x76   : > { %v1536_v18 = vsel %vm1534_vm6, %v1494_v7, 0  ;;  %v2066_v7 = vld [vmem:[%s3849_s3] sm:$0xff] }
  0x77   : > { %2094 = vmatpush.bf16.msra.mxu2 %v1536_v18  ;;  %1543 = vmatpush.bf16.msra.mxu0 %v1536_v18 }
  0x78   : > { %686 = vrot.lane.b32.xlu1 %v2716_v54, %s2229_s19  ;;  %2093 = vmatpush.bf16.msra.mxu1 %v1536_v18 }
  0x79   : > { %1143 = vrot.lane.b32.xlu0 %v1108_v34, %s2236_s30  ;;  %2095 = vmatpush.bf16.msra.mxu3 %v1536_v18  ;;  %v1118_v18 = vsel %vm1103_vm5, %v3875_v59, %v3876_v6  ;;  %v3878_v59 = vrot.slane %v2485_v46, 1 }
  0x7a   : > { %816 = vrot.lane.b32.xlu2 %v749_v12, %s2234_s24  ;;  %v1003_v12 = vrot.slane %v2679_v57, 3 }
  0x7b   : > { %v2744_v34 = vpop.permute.xlu2 %903  ;;  %2097 = vmatpush.bf16.msra.mxu2 %v2067_v41  ;;  %1544 = vmatpush.bf16.msra.mxu0 %v2067_v41 }
  0x7c   : > { %v2769_v22 = vor.u32 %v1003_v12, %v1002_v17  ;;  %v774_v17 = vrot.slane %v2572_v44, 1  ;;  %2096 = vmatpush.bf16.msra.mxu1 %v2067_v41 }
  0x7d   : > { %2098 = vmatpush.bf16.msra.mxu3 %v2067_v41 }
  0x7e   : > { %3926 = vst [vmem:[#allocation21_spill] sm:$0xff] %v2769_v22  ;;  %v1009_v1 = vsel %vm973_vm4, %v2769_v22, %v2771_v49  ;;  %v2797_v12 = vor.u32 %v775_v21, %v774_v17  ;;  %v3928_v17 = vrot.slane %v2345_v3, 1  ;;  %v3885_v22 = vrot.slane %v2602_v38, 1 }
  0x7f   : > { %2100 = vmatpush.bf16.msra.mxu2 %v2066_v7  ;;  %1545 = vmatpush.bf16.msra.mxu0 %v2066_v7 }
  0x80   : > { %946 = vrot.lane.b32.xlu1 %v2741_v13, %s2232_s22  ;;  %2099 = vmatpush.bf16.msra.mxu1 %v2066_v7  ;;  %v777_v6 = vsel %vm713_vm2, %v2540_v58, %v2797_v12 }
  0x81   : > { %893 = vrot.lane.b32.xlu0 %v2749_v20, %s2231_s21  ;;  %2101 = vmatpush.bf16.msra.mxu3 %v2066_v7 }
  0x82   : > { %570 = vrot.lane.b32.xlu2 %v511_v19, %s2233_s23  ;;  %v3877_v19 = vrot.slane %v2561_v4, 1 }
  0x84   : > { %v2782_v29 = vpop.permute.xlu2 %544  ;;  %v2813_v41 = vsel %vm583_vm0, %v3928_v17, %v3877_v19 }
  0x88   : > { %647 = vrot.lane.b32.xlu1 %v2558_v63, %s2230_s20  ;;  %v3927_v63 = vshrl.u32 %v2408_v32, 16 }
  0x89   : > { %1076 = vrot.lane.b32.xlu0 %v1009_v1, %s2235_s25 }
  0x8a   : > { %1153 = vrot.lane.b32.xlu2 %v1118_v18, %s2236_s30  ;;  %v418_v1 = vor.u32 %v3927_v63, %v2548_v61  ;;  %v2818_v18 = vld [vmem:[%s2333_s18 + $0x80] sm:$0xff] }
  0x8b   : > { %v2827_v58 = vshll.u32 %v2818_v18, 16  ;;  %v2830_v3 = vshrl.u32 %v2818_v18, 16  ;;  %v3883_v7 = vrot.slane %v2818_v18, 2  ;;  %v3931_v15 = vrot.slane %v2818_v18, 3 }
  0x8c   : > { %v2815_v21 = vpop.permute.xlu2 %674  ;;  %v423_v32 = vsel %vm395_vm3, %v418_v1, %v3878_v59  ;;  %v3929_v1 = vrot.slane %v2561_v4, 2  ;;  %v730_v59 = vrot.slane %v2624_v33, 1 }
  0x8d   : > { %v1034_v17 = vrot.slane %v2830_v3, 2  ;;  %v1035_v19 = vrot.slane %v2827_v58, 3  ;;  %v1132_v62 = vsel %vm1103_vm5, %v3932_v16, %v3931_v15  ;;  %v3933_v15 = vrot.slane %v2602_v38, 2 }
  0x8f   : > { %v2849_v14 = vor.u32 %v1035_v19, %v1034_v17 }
  0x90   : > { %830 = vrot.lane.b32.xlu1 %v777_v6, %s2234_s24 }
  0x91   : > { %700 = vrot.lane.b32.xlu0 %v2813_v41, %s2229_s19 }
  0x92   : > { %v697_v61 = vpop.permute.xlu1 %696  ;;  %548 = vrot.lane.b32.xlu2 %v423_v32, %s2233_s23  ;;  %v2845_v32 = vsel %vm843_vm1, %v3929_v1, %v3883_v7  ;;  %v1037_v1 = vsel %vm973_vm4, %v2594_v28, %v2849_v14  ;;  %v3930_v7 = vrot.slane %v2479_v35, 1  ;;  %v2879_v35 = vshll.u32 %v2869_v45, 16 }
  0x93   : > { %v644_v63 = vpop.permute.xlu0 %643  ;;  %v3902_v28 = vrot.slane %v2869_v45, 2 }
  0x94   : > { %v1164_v6 = vpop.permute.xlu2 %1163  ;;  %v2864_v19 = vsel %vm583_vm0, %v3930_v7, %v3885_v22 }
  0x95   : > { %v2910_v16 = vsel %vm843_vm1, %v3933_v15, %v3902_v28 }
  0x98   : > { %625 = vrot.lane.b32.xlu1 %v2611_v50, %s2230_s20 }
  0x99   : > { %907 = vrot.lane.b32.xlu0 %v2590_v25, %s2231_s21  ;;  %v2854_v25 = vor.u32 %v731_v47, %v730_v59  ;;  %v2882_v59 = vshrl.u32 %v2869_v45, 16 }
  0x9a   : > { %v957_v20 = vpop.permute.xlu1 %956  ;;  %960 = vrot.lane.b32.xlu2 %v2845_v32, %s2232_s22 }
  0x9b   : > { %v622_v50 = vpop.permute.xlu0 %621  ;;  %v733_v47 = vsel %vm713_vm2, %v2599_v37, %v2854_v25 }
  0x9c   : > { %v2866_v17 = vpop.permute.xlu2 %1064 }
  0xa0   : > { %1090 = vrot.lane.b32.xlu1 %v1037_v1, %s2235_s25 }
  0xa1   : > { %678 = vrot.lane.b32.xlu0 %v2864_v19, %s2229_s19 }
  0xa2   : > { %v827_v7 = vpop.permute.xlu1 %826  ;;  %808 = vrot.lane.b32.xlu2 %v733_v47, %s2234_s24  ;;  %v991_v47 = vrot.slane %v2879_v35, 3 }
  0xa3   : > { %v567_v22 = vpop.permute.xlu0 %566 }
  0xa4   : > { %v1201_v1 = vsel %vm1177_vm7, %v2342_v2, %v567_v22  ;;  %v2895_v33 = vpop.permute.xlu2 %645  ;;  %v990_v22 = vrot.slane %v2882_v59, 2 }
  0xa5   : > { %v1238_v37 = vsel %vm1214_vm8, %v1201_v1, %v644_v63 }
  0xa6   : > { %v1275_v8 = vsel %vm1251_vm10, %v1238_v37, %v697_v61  ;;  %v2912_v61 = vor.u32 %v991_v47, %v990_v22  ;;  %v1179_v37 = vsel %vm1177_vm7, %v2396_v24, %v2782_v29  ;;  %v750_v24 = vrot.slane %v2736_v51, 1 }
  0xa7   : > { %v1312_v23 = vsel %vm1288_vm9, %v1275_v8, %v827_v7  ;;  %v3934_v8 = vrot.slane %v2653_v27, 1  ;;  %v1216_v15 = vsel %vm1214_vm8, %v1179_v37, %v622_v50  ;;  %v751_v29 = vrot.slane %v2733_v30, 2 }
  0xa8   : > { %v1349_v63 = vsel %vm1325_vm11, %v1312_v23, %v2744_v34  ;;  %885 = vrot.lane.b32.xlu1 %v2661_v42, %s2231_s21  ;;  %v3898_v34 = vrot.slane %v2679_v57, 1  ;;  %v993_v47 = vsel %vm973_vm4, %v2663_v5, %v2912_v61  ;;  %v3894_v5 = vrot.slane %v2869_v45, 3 }
  0xa9   : > { %1167 = vrot.lane.b32.xlu0 %v1132_v62, %s2236_s30  ;;  %v458_v23 = vor.u32 %v2676_v26, %v3934_v8  ;;  %v1386_v62 = vsel %vm1362_vm12, %v1349_v63, %v957_v20  ;;  %v1253_v8 = vsel %vm1251_vm10, %v1216_v15, %v2815_v21  ;;  %v3935_v37 = vrot.slane %v2670_v55, 1 }
  0xaa   : > { %v805_v42 = vpop.permute.xlu1 %804  ;;  %938 = vrot.lane.b32.xlu2 %v2910_v16, %s2232_s22  ;;  %v3936_v21 = vrot.slane %v2602_v38, 3 }
  0xab   : > { %v1087_v7 = vpop.permute.xlu0 %1086  ;;  %v463_v20 = vsel %vm395_vm3, %v458_v23, %v3898_v34  ;;  %v1290_v50 = vsel %vm1288_vm9, %v1253_v8, %v805_v42 }
  0xac   : > { %v1423_v1 = vsel %vm1399_vm13, %v1386_v62, %v1087_v7  ;;  %v2933_v63 = vpop.permute.xlu2 %546  ;;  %v1110_v42 = vsel %vm1103_vm5, %v3936_v21, %v3894_v5  ;;  %v3896_v21 = vrot.slane %v2569_v43, 1 }
  0xad   : > { %v1460_v22 = vsel %vm1436_vm14, %v1423_v1, %v1164_v6  ;;  %v3897_v6 = vrot.slane %v2707_v60, 1  ;;  %v2948_v1 = vor.u32 %v751_v29, %v750_v24 }
  0xae   : > { %2006 = vmatmul.msk.bf16.vlgmr.msra.gmra.mxu2 %vm1497_vm15, %v1460_v22 }
  0xaf   : > { %v2955_v22 = vsel %vm583_vm0, %v3935_v37, %v3897_v6  ;;  %v753_v15 = vsel %vm713_vm2, %v2711_v40, %v2948_v1  ;;  %v3937_v40 = vrot.slane %v2440_v52, 1  ;;  %v3940_v6 = vrot.slane %v2485_v46, 1 }
  0xb0   : > { %1068 = vrot.lane.b32.xlu1 %v993_v47, %s2235_s25 }
  0xb1   : > { %558 = vrot.lane.b32.xlu0 %v463_v20, %s2233_s23  ;;  %v514_v37 = vor.u32 %v2443_v53, %v3937_v40 }
  0xb2   : > { %v935_v23 = vpop.permute.xlu1 %934  ;;  %635 = vrot.lane.b32.xlu2 %v2716_v54, %s2230_s20  ;;  %v2965_v54 = vld [vmem:[%s2333_s18 + $0x50] sm:$0xff] }
  0xb3   : > { %v882_v62 = vpop.permute.xlu0 %881  ;;  %v3895_v24 = vrot.slane %v2965_v54, 2  ;;  %v2976_v29 = vshll.u32 %v2965_v54, 16  ;;  %v2979_v8 = vshrl.u32 %v2965_v54, 16  ;;  %v519_v52 = vsel %vm395_vm3, %v514_v37, %v3896_v21 }
  0xb4   : > { %v1327_v7 = vsel %vm1325_vm11, %v1290_v50, %v882_v62  ;;  %v2962_v47 = vpop.permute.xlu2 %958  ;;  %v3939_v37 = vrot.slane %v2707_v60, 3 }
  0xb5   : > { %v1364_v20 = vsel %vm1362_vm12, %v1327_v7, %v935_v23 }
  0xb6   : > { %v1401_v23 = vsel %vm1399_vm13, %v1364_v20, %v2866_v17  ;;  %v1010_v20 = vrot.slane %v2979_v8, 2 }
  0xb8   : > { %688 = vrot.lane.b32.xlu1 %v2955_v22, %s2229_s19 }
  0xb9   : > { %1145 = vrot.lane.b32.xlu0 %v1110_v42, %s2236_s30  ;;  %v3938_v42 = vrot.slane %v2707_v60, 2 }
  0xba   : > { %v569_v62 = vpop.permute.xlu1 %568  ;;  %818 = vrot.lane.b32.xlu2 %v753_v15, %s2234_s24  ;;  %v1011_v15 = vrot.slane %v2976_v29, 3 }
  0xbb   : > { %v1142_v50 = vpop.permute.xlu0 %1141  ;;  %v2995_v5 = vsel %vm843_vm1, %v3938_v42, %v3895_v24  ;;  %v779_v24 = vrot.slane %v2827_v58, 2  ;;  %v1203_v46 = vsel %vm1177_vm7, %v2336_v0, %v569_v62 }
  0xbc   : > { %v1438_v7 = vsel %vm1436_vm14, %v1401_v23, %v1142_v50  ;;  %v2997_v17 = vpop.permute.xlu2 %806  ;;  %v3008_v53 = vor.u32 %v1011_v15, %v1010_v20 }
  0xbd   : > { %1995 = vmatmul.msk.bf16.vlgmr.msra.gmra.mxu0 %vm1497_vm15, %v1438_v7  ;;  %v3900_v7 = vrot.slane %v2965_v54, 3 }
  0xbe   : > { %v1013_v40 = vsel %vm973_vm4, %v2771_v49, %v3008_v53  ;;  %v3899_v49 = vrot.slane %v2818_v18, 1 }
  0xbf   : > { %v1120_v20 = vsel %vm1103_vm5, %v3939_v37, %v3900_v7 }
  0xc0   : > { %948 = vrot.lane.b32.xlu1 %v2995_v5, %s2232_s22 }
  0xc1   : > { %895 = vrot.lane.b32.xlu0 %v2741_v13, %s2231_s21  ;;  %v778_v13 = vrot.slane %v2830_v3, 1 }
  0xc2   : > { %v829_v50 = vpop.permute.xlu1 %828  ;;  %572 = vrot.lane.b32.xlu2 %v519_v52, %s2233_s23 }
  0xc3   : > { %v699_v23 = vpop.permute.xlu0 %698  ;;  %v3027_v15 = vor.u32 %v779_v24, %v778_v13  ;;  %v3941_v24 = vrot.slane %v2561_v4, 1  ;;  %v1240_v4 = vsel %vm1214_vm8, %v1203_v46, %v2895_v33 }
  0xc4   : > { %v3015_v42 = vpop.permute.xlu2 %936  ;;  %v1277_v62 = vsel %vm1251_vm10, %v1240_v4, %v699_v23  ;;  %v3942_v23 = vrot.slane %v2818_v18, 2  ;;  %v735_v4 = vrot.slane %v2879_v35, 2 }
  0xc5   : > { %v781_v34 = vsel %vm713_vm2, %v2797_v12, %v3027_v15  ;;  %v3043_v13 = vsel %vm583_vm0, %v3941_v24, %v3899_v49  ;;  %v1314_v7 = vsel %vm1288_vm9, %v1277_v62, %v829_v50 }
  0xc8   : > { %649 = vrot.lane.b32.xlu1 %v2813_v41, %s2230_s20  ;;  %v426_v41 = vor.u32 %v2488_v48, %v3940_v6 }
  0xc9   : > { %1078 = vrot.lane.b32.xlu0 %v1013_v40, %s2235_s25  ;;  %v3901_v40 = vrot.slane %v2627_v39, 1 }
  0xca   : > { %v624_v52 = vpop.permute.xlu1 %623  ;;  %1155 = vrot.lane.b32.xlu2 %v1120_v20, %s2236_s30  ;;  %v3048_v20 = vld [vmem:[%s2333_s18 + $0x88] sm:$0xff] }
  0xcb   : > { %v906_v21 = vpop.permute.xlu0 %905  ;;  %v431_v48 = vsel %vm395_vm3, %v426_v41, %v3901_v40  ;;  %v3061_v12 = vshll.u32 %v3048_v20, 16  ;;  %v3064_v6 = vshrl.u32 %v3048_v20, 16  ;;  %v875_v49 = vrot.slane %v3048_v20, 2 }
  0xcc   : > { %v3045_v37 = vpop.permute.xlu2 %633  ;;  %v1351_v40 = vsel %vm1325_vm11, %v1314_v7, %v906_v21 }
  0xcd   : > { %v1038_v33 = vrot.slane %v3064_v6, 2  ;;  %v1039_v46 = vrot.slane %v3061_v12, 3  ;;  %v3084_v50 = vsel %vm843_vm1, %v3942_v23, %v875_v49  ;;  %v1388_v21 = vsel %vm1362_vm12, %v1351_v40, %v2962_v47 }
  0xce   : > { %v3943_v40 = vrot.slane %v2602_v38, 1 }
  0xcf   : > { %v3090_v7 = vor.u32 %v1039_v46, %v1038_v33 }
  0xd0   : > { %832 = vrot.lane.b32.xlu1 %v781_v34, %s2234_s24 }
  0xd1   : > { %702 = vrot.lane.b32.xlu0 %v3043_v13, %s2229_s19  ;;  %v1041_v47 = vsel %vm973_vm4, %v2849_v14, %v3090_v7 }
  0xd2   : > { %v1089_v24 = vpop.permute.xlu1 %1088  ;;  %550 = vrot.lane.b32.xlu2 %v431_v48, %s2233_s23  ;;  %v734_v48 = vrot.slane %v2882_v59, 1 }
  0xd3   : > { %v677_v34 = vpop.permute.xlu0 %676 }
  0xd4   : > { %v3070_v41 = vpop.permute.xlu2 %816  ;;  %v3098_v23 = vor.u32 %v735_v4, %v734_v48 }
  0xd6   : > { %v737_v14 = vsel %vm713_vm2, %v2854_v25, %v3098_v23 }
  0xd8   : > { %627 = vrot.lane.b32.xlu1 %v2864_v19, %s2230_s20  ;;  %v593_v19 = vrot.slane %v2869_v45, 1 }
  0xd9   : > { %909 = vrot.lane.b32.xlu0 %v2845_v32, %s2231_s21  ;;  %v1425_v32 = vsel %vm1399_vm13, %v1388_v21, %v1089_v24  ;;  %v3944_v21 = vrot.slane %v2818_v18, 3 }
  0xda   : > { %v884_v62 = vpop.permute.xlu1 %883  ;;  %962 = vrot.lane.b32.xlu2 %v3084_v50, %s2232_s22  ;;  %v3108_v24 = vsel %vm583_vm0, %v3943_v40, %v593_v19 }
  0xdb   : > { %v1166_v28 = vpop.permute.xlu0 %1165 }
  0xdc   : > { %v1462_v55 = vsel %vm1436_vm14, %v1425_v32, %v1166_v28  ;;  %v3110_v33 = vpop.permute.xlu2 %570  ;;  %v1181_v28 = vsel %vm1177_vm7, %v2354_v10, %v2933_v63  ;;  %v3909_v10 = vrot.slane %v2614_v11, 2  ;;  %v994_v32 = vrot.slane %v2650_v9, 2 }
  0xdd   : > { %2007 = vmatmul.msk.bf16.gmra.mxu2 %vm1497_vm15, %v1462_v55  ;;  %v1218_v38 = vsel %vm1214_vm8, %v1181_v28, %v624_v52  ;;  %v1133_v55 = vrot.slane %v3048_v20, 3 }
  0xde   : > { %v1255_v46 = vsel %vm1251_vm10, %v1218_v38, %v677_v34  ;;  %v995_v34 = vrot.slane %v2633_v56, 3  ;;  %v3946_v38 = vrot.slane %v2679_v57, 1 }
  0xdf   : > { %v1292_v63 = vsel %vm1288_vm9, %v1255_v46, %v2997_v17  ;;  %v1134_v25 = vsel %vm1103_vm5, %v3944_v21, %v1133_v55  ;;  %v3945_v17 = vrot.slane %v2869_v45, 2 }
  0xe0   : > { %1092 = vrot.lane.b32.xlu1 %v1041_v47, %s2235_s25  ;;  %v1329_v47 = vsel %vm1325_vm11, %v1292_v63, %v884_v62  ;;  %v466_v62 = vor.u32 %v2682_v36, %v3946_v38 }
  0xe1   : > { %680 = vrot.lane.b32.xlu0 %v3108_v24, %s2229_s19  ;;  %v3144_v40 = vsel %vm843_vm1, %v3945_v17, %v3909_v10  ;;  %v1366_v28 = vsel %vm1362_vm12, %v1329_v47, %v3015_v42  ;;  %v3905_v47 = vrot.slane %v2965_v54, 1 }
  0xe2   : > { %v1067_v48 = vpop.permute.xlu1 %1066  ;;  %810 = vrot.lane.b32.xlu2 %v737_v14, %s2234_s24  ;;  %v3148_v14 = vor.u32 %v995_v34, %v994_v32  ;;  %v754_v32 = vrot.slane %v2979_v8, 1  ;;  %v755_v34 = vrot.slane %v2976_v29, 2 }
  0xe3   : > { %v557_v4 = vpop.permute.xlu0 %556  ;;  %v1403_v46 = vsel %vm1399_vm13, %v1366_v28, %v1067_v48 }
  0xe4   : > { %v1154_v52 = vpop.permute.xlu2 %1153  ;;  %v997_v42 = vsel %vm973_vm4, %v2912_v61, %v3148_v14  ;;  %v1191_v48 = vsel %vm1177_vm7, %v2614_v11, %v557_v4  ;;  %v3906_v61 = vrot.slane %v2614_v11, 3  ;;  %v3180_v4 = vor.u32 %v755_v34, %v754_v32 }
  0xe5   : > { %v1228_v17 = vsel %vm1214_vm8, %v1191_v48, %v3045_v37  ;;  %v3948_v37 = vrot.slane %v2869_v45, 3 }
  0xe8   : > { %887 = vrot.lane.b32.xlu1 %v2910_v16, %s2231_s21  ;;  %v3908_v16 = vrot.slane %v2733_v30, 1 }
  0xe9   : > { %1169 = vrot.lane.b32.xlu0 %v1134_v25, %s2236_s30 }
  0xea   : > { %v687_v63 = vpop.permute.xlu1 %686  ;;  %940 = vrot.lane.b32.xlu2 %v3144_v40, %s2232_s22  ;;  %v471_v57 = vsel %vm395_vm3, %v466_v62, %v3908_v16 }
  0xeb   : > { %v1144_v21 = vpop.permute.xlu0 %1143  ;;  %v1265_v62 = vsel %vm1251_vm10, %v1228_v17, %v687_v63 }
  0xec   : > { %v1440_v25 = vsel %vm1436_vm14, %v1403_v46, %v1144_v21  ;;  %v3165_v36 = vpop.permute.xlu2 %548  ;;  %v3947_v46 = vrot.slane %v2707_v60, 1  ;;  %v757_v60 = vsel %vm713_vm2, %v2948_v1, %v3180_v4  ;;  %v3950_v1 = vrot.slane %v2965_v54, 2 }
  0xed   : > { %1996 = vmatmul.msk.bf16.gmra.mxu0 %vm1497_vm15, %v1440_v25  ;;  %v1112_v25 = vsel %vm1103_vm5, %v3948_v37, %v3906_v61 }
  0xee   : > { %v3187_v21 = vsel %vm583_vm0, %v3947_v46, %v3905_v47  ;;  %v526_v46 = vrot.slane %v2827_v58, 1  ;;  %v3960_v58 = vrot.slane %v2733_v30, 1 }
  0xf0   : > { %1070 = vrot.lane.b32.xlu1 %v997_v42, %s2235_s25 }
  0xf1   : > { %560 = vrot.lane.b32.xlu0 %v471_v57, %s2233_s23  ;;  %v3904_v57 = vrot.slane %v2342_v2, 2 }
  0xf2   : > { %v947_v28 = vpop.permute.xlu1 %946  ;;  %637 = vrot.lane.b32.xlu2 %v2955_v22, %s2230_s20  ;;  %v1302_v22 = vsel %vm1288_vm9, %v1265_v62, %v3070_v41 }
  0xf3   : > { %v894_v38 = vpop.permute.xlu0 %893 }
  0xf4   : > { %v3194_v42 = vpop.permute.xlu2 %960  ;;  %v1339_v63 = vsel %vm1325_vm11, %v1302_v22, %v894_v38  ;;  %v3949_v38 = vrot.slane %v2569_v43, 1 }
  0xf5   : > { %v1376_v34 = vsel %vm1362_vm12, %v1339_v63, %v947_v28  ;;  %v3220_v28 = vsel %vm843_vm1, %v3950_v1, %v3904_v57  ;;  %v3953_v57 = vrot.slane %v2627_v39, 1 }
  0xf6   : > { %v522_v62 = vor.u32 %v2572_v44, %v3949_v38  ;;  %v783_v38 = vrot.slane %v3061_v12, 2 }
  0xf8   : > { %690 = vrot.lane.b32.xlu1 %v3187_v21, %s2229_s19  ;;  %v527_v43 = vsel %vm395_vm3, %v522_v62, %v526_v46  ;;  %v3952_v62 = vrot.slane %v2965_v54, 3 }
  0xf9   : > { %1147 = vrot.lane.b32.xlu0 %v1112_v25, %s2236_s30  ;;  %v1014_v25 = vrot.slane %v2405_v31, 2 }
  0xfa   : > { %v648_v48 = vpop.permute.xlu1 %647  ;;  %820 = vrot.lane.b32.xlu2 %v757_v60, %s2234_s24 }
  0xfb   : > { %v1077_v32 = vpop.permute.xlu0 %1076 }
  0xfc   : > { %v1413_v17 = vsel %vm1399_vm13, %v1376_v34, %v1077_v32  ;;  %v3222_v37 = vpop.permute.xlu2 %808  ;;  %v3237_v32 = vld [vmem:[%s2333_s18 + $0x58] sm:$0xff] }
  0xfd   : > { %v1450_v41 = vsel %vm1436_vm14, %v1413_v17, %v1154_v52  ;;  %v3951_v52 = vld [vmem:[#allocation12_spill] sm:$0xff]  ;;  %v3907_v34 = vrot.slane %v3237_v32, 3 }
  0xfe   : > { %2001 = vmatmul.msk.bf16.vlgmr.msra.gmra.mxu1 %vm1497_vm15, %v1450_v41  ;;  %v1015_v22 = vrot.slane %v3951_v52, 3 }
  0xff   : > { %v1122_v1 = vsel %vm1103_vm5, %v3952_v62, %v3907_v34  ;;  %v3277_v34 = vld [vmem:[%s2333_s18 + $0x90] sm:$0xff] }
 0x100   : > { %950 = vrot.lane.b32.xlu1 %v3220_v28, %s2232_s22  ;;  %v3233_v44 = vor.u32 %v1015_v22, %v1014_v25  ;;  %v3258_v25 = vrot.slane %v3048_v20, 1 }
 0x101   : > { %897 = vrot.lane.b32.xlu0 %v2995_v5, %s2231_s21  ;;  %v782_v5 = vrot.slane %v3064_v6, 1 }
 0x102   : > { %v831_v63 = vpop.permute.xlu1 %830  ;;  %574 = vrot.lane.b32.xlu2 %v527_v43, %s2233_s23  ;;  %v1017_v17 = vsel %vm973_vm4, %v3008_v53, %v3233_v44 }
 0x103   : > { %v701_v60 = vpop.permute.xlu0 %700  ;;  %v3255_v53 = vor.u32 %v783_v38, %v782_v5  ;;  %v3955_v5 = vrot.slane %v2818_v18, 1 }
 0x104   : > { %v3243_v41 = vpop.permute.xlu2 %938 }
 0x105   : > { %v785_v61 = vsel %vm713_vm2, %v3027_v15, %v3255_v53  ;;  %v3272_v38 = vsel %vm583_vm0, %v3955_v5, %v3258_v25 }
 0x108   : > { %651 = vrot.lane.b32.xlu1 %v3043_v13, %s2230_s20  ;;  %v3954_v13 = vld [vmem:[#allocation15_spill] sm:$0xff] }
 0x109   : > { %1080 = vrot.lane.b32.xlu0 %v1017_v17, %s2235_s25  ;;  %v434_v47 = vor.u32 %v3954_v13, %v3953_v57  ;;  %v438_v17 = vrot.slane %v2879_v35, 1  ;;  %v787_v57 = vshrl.u32 %v3277_v34, 16  ;;  %v790_v13 = vshll.u32 %v3277_v34, 16 }
 0x10a   : > { %v626_v22 = vpop.permute.xlu1 %625  ;;  %1157 = vrot.lane.b32.xlu2 %v1122_v1, %s2236_s30  ;;  %v2152_v1 = vld [vmem:[%s2333_s18 + $0x68] sm:$0xff] }
 0x10b   : > { %v908_v43 = vpop.permute.xlu0 %907  ;;  %v1205_v39 = vsel %vm1177_vm7, %v2152_v1, %v3110_v33  ;;  %v439_v18 = vsel %vm395_vm3, %v434_v47, %v438_v17  ;;  %v3294_v33 = vrot.slane %v3277_v34, 2  ;;  %v1042_v47 = vrot.slane %v787_v57, 2 }
 0x10c   : > { %v3274_v62 = vpop.permute.xlu2 %635  ;;  %v1242_v15 = vsel %vm1214_vm8, %v1205_v39, %v648_v48  ;;  %v1043_v48 = vrot.slane %v790_v13, 3 }
 0x10d   : > { %v1279_v5 = vsel %vm1251_vm10, %v1242_v15, %v701_v60  ;;  %v738_v60 = vrot.slane %v2650_v9, 1 }
 0x10e   : > { %v3318_v15 = vor.u32 %v1043_v48, %v1042_v47  ;;  %v2153_v48 = vld [vmem:[%s2333_s18 + $0x10] sm:$0xff]  }
 0x110   : > { %834 = vrot.lane.b32.xlu1 %v785_v61, %s2234_s24  ;;  %v1316_v61 = vsel %vm1288_vm9, %v1279_v5, %v831_v63  ;;  %v3312_v63 = vsel %vm843_vm1, %v875_v49, %v3294_v33  ;;  %v1045_v9 = vsel %vm973_vm4, %v3090_v7, %v3318_v15 }
 0x111   : > { %704 = vrot.lane.b32.xlu0 %v3272_v38, %s2229_s19  ;;  %v1353_v39 = vsel %vm1325_vm11, %v1316_v61, %v908_v43 }
 0x112   : > { %v1091_v16 = vpop.permute.xlu1 %1090  ;;  %552 = vrot.lane.b32.xlu2 %v439_v18, %s2233_s23  ;;  %v739_v18 = vrot.slane %v2633_v56, 2  ;;  %v1390_v43 = vsel %vm1362_vm12, %v1353_v39, %v3194_v42  ;;  %v3956_v42 = vrot.slane %v2614_v11, 1  ;;  %v1183_v39 = vsel %vm1177_vm7, %v2153_v48, %v3165_v36 }
 0x113   : > { %v679_v10 = vpop.permute.xlu0 %678  ;;  %v1220_v45 = vsel %vm1214_vm8, %v1183_v39, %v626_v22 }
 0x114   : > { %v3297_v1 = vpop.permute.xlu2 %818  ;;  %v3325_v49 = vor.u32 %v739_v18, %v738_v60  ;;  %v1257_v60 = vsel %vm1251_vm10, %v1220_v45, %v679_v10  ;;  %v530_v10 = vor.u32 %v2830_v3, %v526_v46  ;;  %v474_v3 = vor.u32 %v2736_v51, %v3960_v58 }
 0x115   : > { %v1294_v36 = vsel %vm1288_vm9, %v1257_v60, %v3222_v37  ;;  %v478_v46 = vrot.slane %v2976_v29, 1 }
 0x116   : > { %v741_v7 = vsel %vm713_vm2, %v3098_v23, %v3325_v49 }
 0x117   : > { %v479_v30 = vsel %vm395_vm3, %v474_v3, %v478_v46  ;;  %v759_v3 = vrot.slane %v3951_v52, 2 }
 0x118   : > { %629 = vrot.lane.b32.xlu1 %v3108_v24, %s2230_s20  ;;  %v1427_v24 = vsel %vm1399_vm13, %v1390_v43, %v1091_v16  ;;  %v3335_v16 = vsel %vm583_vm0, %v593_v19, %v3956_v42  ;;  %v1135_v19 = vrot.slane %v3277_v34, 3 }
 0x119   : > { %911 = vrot.lane.b32.xlu0 %v3084_v50, %s2231_s21 }
 0x11a   : > { %v886_v5 = vpop.permute.xlu1 %885  ;;  %964 = vrot.lane.b32.xlu2 %v3312_v63, %s2232_s22 }
 0x11b   : > { %v1168_v50 = vpop.permute.xlu0 %1167  ;;  %v1331_v22 = vsel %vm1325_vm11, %v1294_v36, %v886_v5  ;;  %v999_v5 = vrot.slane %v2653_v27, 3 }
 0x11c   : > { %v1464_v61 = vsel %vm1436_vm14, %v1427_v24, %v1168_v50  ;;  %v3337_v47 = vpop.permute.xlu2 %572  ;;  %v1136_v24 = vsel %vm1103_vm5, %v1133_v55, %v1135_v19  ;;  %v3957_v50 = vld [vmem:[#allocation16_spill] sm:$0xff]  ;;  %v998_v55 = vrot.slane %v2676_v26, 2 }
 0x11d   : > { %2008 = vmatmul.msk.bf16.gmra.mxu2 %vm1497_vm15, %v1464_v61  ;;  %v3958_v37 = vrot.slane %v3957_v50, 2  ;;  %v3959_v61 = vrot.slane %v2614_v11, 2 }
 0x11e   : > { %v3387_v27 = vor.u32 %v999_v5, %v998_v55  ;;  %v670_v5 = vrot.slane %v3277_v34, 1 }
 0x11f   : > { %v3371_v20 = vsel %vm843_vm1, %v3959_v61, %v3958_v37 }
 0x120   : > { %1094 = vrot.lane.b32.xlu1 %v1045_v9, %s2235_s25  ;;  %v534_v9 = vrot.slane %v3061_v12, 1  ;;  %v1001_v60 = vsel %vm973_vm4, %v3148_v14, %v3387_v27 }
 0x121   : > { %682 = vrot.lane.b32.xlu0 %v3335_v16, %s2229_s19 }
 0x122   : > { %v1069_v18 = vpop.permute.xlu1 %1068  ;;  %812 = vrot.lane.b32.xlu2 %v741_v7, %s2234_s24  ;;  %v535_v26 = vsel %vm395_vm3, %v530_v10, %v534_v9  ;;  %v1113_v10 = vrot.slane %v3957_v50, 3 }
 0x123   : > { %v559_v43 = vpop.permute.xlu0 %558 }
 0x124   : > { %v1156_v23 = vpop.permute.xlu2 %1155 }
 0x128   : > { %889 = vrot.lane.b32.xlu1 %v3144_v40, %s2231_s21  ;;  %v1368_v40 = vsel %vm1362_vm12, %v1331_v22, %v3243_v41  ;;  %v1193_v41 = vsel %vm1177_vm7, %v3957_v50, %v559_v43  ;;  %v3410_v43 = vld [vmem:[%s3850_s4] ss:$0 sm:$0xff] }
 0x129   : > { %1171 = vrot.lane.b32.xlu0 %v1136_v24, %s2236_s30  ;;  %v1405_v42 = vsel %vm1399_vm13, %v1368_v40, %v1069_v18  ;;  %v1230_v18 = vsel %vm1214_vm8, %v1193_v41, %v3274_v62  ;;  %v3961_v40 = vrot.slane %v2614_v11, 3 }
 0x12a   : > { %v689_v48 = vpop.permute.xlu1 %688  ;;  %942 = vrot.lane.b32.xlu2 %v3371_v20, %s2232_s22 }
 0x12b   : > { %v1146_v39 = vpop.permute.xlu0 %1145  ;;  %v1267_v22 = vsel %vm1251_vm10, %v1230_v18, %v689_v48  ;;  %v1114_v58 = vsel %vm1103_vm5, %v3961_v40, %v1113_v10 }
 0x12c   : > { %v1442_v7 = vsel %vm1436_vm14, %v1405_v42, %v1146_v39  ;;  %v3395_v51 = vpop.permute.xlu2 %550  ;;  %v1304_v14 = vsel %vm1288_vm9, %v1267_v22, %v3297_v1  ;;  %v758_v1 = vrot.slane %v2405_v31, 1  ;;  %v671_v31 = vsel %vm583_vm0, %v3258_v25, %v670_v5 }
 0x12d   : > { %1997 = vmatmul.msk.bf16.gmra.mxu0 %vm1497_vm15, %v1442_v7 }
 0x12e   : > { %v3441_v41 = vor.u32 %v759_v3, %v758_v1 }
 0x130   : > { %576 = vrot.lane.b32.xlu1 %v535_v26, %s2233_s23 }
 0x131   : > { %562 = vrot.lane.b32.xlu0 %v479_v30, %s2233_s23  ;;  %v1602_v45 = vpop.f32.mrf.mxu2 }
 0x132   : > { %v949_v36 = vpop.permute.xlu1 %948  ;;  %1072 = vrot.lane.b32.xlu2 %v1001_v60, %s2235_s25  ;;  %v1603_v62 = vadd.f32 %v3410_v43, %v1602_v45  ;;  %v3962_v45 = vrot.slane %v2342_v2, 1  ;;  %v3963_v60 = vrot.slane %v2965_v54, 1  ;;  %v761_v54 = vsel %vm713_vm2, %v3180_v4, %v3441_v41 }
 0x133   : > { %v896_v24 = vpop.permute.xlu0 %895 }
 0x134   : > { %v3414_v37 = vpop.permute.xlu2 %962  ;;  %v1341_v61 = vsel %vm1325_vm11, %v1304_v14, %v896_v24  ;;  %v1659_v7 = vmax.f32 %v1603_v62, 0.0  ;;  %v3449_v18 = vsel %vm583_vm0, %v3963_v60, %v3962_v45  ;;  %v792_v24 = vrot.slane %v790_v13, 2 }
 0x135   : > { %v3966_v60 = vrot.slane %v2336_v0, 2 }
 0x138   : > { %653 = vrot.lane.b32.xlu1 %v3272_v38, %s2230_s20 }
 0x139   : > { %639 = vrot.lane.b32.xlu0 %v3187_v21, %s2230_s20  ;;  %v1604_v55 = vpop.f32.mrf.mxu2  ;;  %v1378_v21 = vsel %vm1362_vm12, %v1341_v61, %v949_v36 }
 0x13a   : > { %v1605_v42 = vadd.f32 %v3410_v43, %v1604_v55  ;;  %v1547_v48 = vpop.f32.mrf.mxu0  ;;  %v650_v38 = vpop.permute.xlu1 %649  ;;  %1149 = vrot.lane.b32.xlu2 %v1114_v58, %s2236_s30 }
 0x13b   : > { %v1079_v39 = vpop.permute.xlu0 %1078  ;;  %v1548_v14 = vadd.f32 %v3410_v43, %v1547_v48  ;;  %v3964_v48 = vld [vmem:[#allocation10_spill] sm:$0xff] }
 0x13c   : > { %v1660_v26 = vmax.f32 %v1605_v42, 0.0  ;;  %v1415_v30 = vsel %vm1399_vm13, %v1378_v21, %v1079_v39  ;;  %v3451_v36 = vpop.permute.xlu2 %810  ;;  %v3476_v42 = vld [vmem:[%s2333_s18 + $0x98] sm:$0xff]  ;;  %v1018_v39 = vrot.slane %v3964_v48, 2 }
 0x13d   : > { %v1452_v11 = vsel %vm1436_vm14, %v1415_v30, %v1156_v23  ;;  %v789_v23 = vrot.slane %v787_v57, 1  ;;  %v1637_v40 = vmax.f32 %v1548_v14, 0.0  ;;  %v3965_v21 = vld [vmem:[#allocation9_spill] sm:$0xff]  ;;  %v1050_v30 = vshll.u32 %v3476_v42, 16 }
 0x13e   : > { %2002 = vmatmul.msk.bf16.gmra.mxu1 %vm1497_vm15, %v1452_v11  ;;  %v3457_v22 = vpack.c.bf16 %v1660_v26, %v1659_v7  ;;  %v1019_v7 = vrot.slane %v3965_v21, 3  ;;  %v930_v26 = vrot.slane %v3476_v42, 2  ;;  %v1137_v21 = vrot.slane %v3476_v42, 3 }
 0x13f   : > { %v3466_v61 = vor.u32 %v792_v24, %v789_v23  ;;  %v3967_v23 = vrot.slane %v2342_v2, 2 }
 0x140   : > { %706 = vrot.lane.b32.xlu1 %v671_v31, %s2229_s19  ;;  %v931_v45 = vsel %vm843_vm1, %v3294_v33, %v930_v26 }
 0x141   : > { %692 = vrot.lane.b32.xlu0 %v3449_v18, %s2229_s19  ;;  %v794_v1 = vsel %vm713_vm2, %v3255_v53, %v3466_v61  ;;  %v1047_v53 = vshrl.u32 %v3476_v42, 16  ;;  %v3501_v24 = vsel %vm843_vm1, %v3967_v23, %v3966_v60  ;;  %v288_v23 = vld [vmem:[%s2333_s18 + $0x90] sm:$0x1] }
 0x142   : > { %v1549_v62 = vpop.f32.mrf.mxu0  ;;  %v833_v13 = vpop.permute.xlu1 %832  ;;  %822 = vrot.lane.b32.xlu2 %v761_v54, %s2234_s24  ;;  %v393_v35 = vunpack.c.l.b16 %v288_v23 }
 0x143   : > { %v1550_v57 = vadd.f32 %v3410_v43, %v1549_v62  ;;  %v703_v55 = vpop.permute.xlu0 %702  ;;  %v1049_v54 = vrot.slane %v1047_v53, 2  ;;  %v1052_v62 = vrot.slane %v1050_v30, 3 }
 0x144   : > { %v3473_v3 = vpop.permute.xlu2 %940 }
 0x145   : > { %v1638_v58 = vmax.f32 %v1550_v57, 0.0  ;;  %v2154_v57 = vld [vmem:[%s2333_s18 + $0x70] sm:$0xff] }
 0x147   : > { %v3478_v4 = vpack.c.bf16 %v1638_v58, %v1637_v40  ;;  %v3516_v40 = vld [vmem:[%s2333_s18 + $0x60] sm:$0xff] }
 0x148   : > { %899 = vrot.lane.b32.xlu1 %v3220_v28, %s2231_s21  ;;  %v3490_v28 = vor.u32 %v1019_v7, %v1018_v39  ;;  %v1123_v58 = vrot.slane %v3516_v40, 3 }
 0x149   : > { %836 = vrot.lane.b32.xlu0 %v794_v1, %s2234_s24  ;;  %v3519_v1 = vor.u32 %v1052_v62, %v1049_v54 }
 0x14a   : > { %v628_v11 = vpop.permute.xlu1 %627  ;;  %913 = vrot.lane.b32.xlu2 %v3312_v63, %s2231_s21  ;;  %v1207_v63 = vsel %vm1177_vm7, %v2154_v57, %v3337_v47  ;;  %v1021_v0 = vsel %vm973_vm4, %v3233_v44, %v3490_v28  ;;  %v3968_v44 = vrot.slane %v3237_v32, 3  ;;  %v1138_v32 = vsel %vm1103_vm5, %v1135_v19, %v1137_v21  ;;  %v2156_v57 = vld [vmem:[%s2333_s18 + $0x18] sm:$0xff] }
 0x14b   : > { %v910_v31 = vpop.permute.xlu0 %909  ;;  %v1244_v2 = vsel %vm1214_vm8, %v1207_v63, %v650_v38  ;;  %v1054_v53 = vsel %vm973_vm4, %v3318_v15, %v3519_v1  ;;  %v442_v15 = vor.u32 %v2882_v59, %v438_v17  ;;  %v3969_v19 = vrot.slane %v2633_v56, 1 }
 0x14c   : > { %v3503_v14 = vpop.permute.xlu2 %637  ;;  %v1281_v48 = vsel %vm1251_vm10, %v1244_v2, %v703_v55  ;;  %v1124_v38 = vsel %vm1103_vm5, %v3968_v44, %v1123_v58  ;;  %v1185_v59 = vsel %vm1177_vm7, %v2156_v57, %v3395_v51  ;;  %v394_v63 = vpack.c.b16 %v393_v35, %v393_v35 }
 0x14d   : > { %v1318_v7 = vsel %vm1288_vm9, %v1281_v48, %v833_v13  ;;  %v447_v62 = vsel %vm395_vm3, %v442_v15, %v3969_v19  ;;  %v1222_v17 = vsel %vm1214_vm8, %v1185_v59, %v628_v11  ;;  %v3970_v48 = vld [vmem:[#allocation18_spill] sm:$0xff]  ;;  %v3972_v15 = vld [vmem:[#allocation20_spill] sm:$0xff] }
 0x14e   : > { %v1355_v30 = vsel %vm1325_vm11, %v1318_v7, %v910_v31  ;;  %v3971_v7 = vld [vmem:[#allocation19_spill] sm:$0xff]  ;;  %v540_v44 = vshll.u32 %v394_v63, 16 }
 0x14f   : > { %v1392_v13 = vsel %vm1362_vm12, %v1355_v30, %v3414_v37  ;;  %v745_v51 = vsel %vm713_vm2, %v3325_v49, %v3971_v7  ;;  %v538_v49 = vor.u32 %v3064_v6, %v534_v9  ;;  %v3973_v6 = vrot.slane %v3951_v52, 1 }
 0x150   : > { %966 = vrot.lane.b32.xlu1 %v931_v45, %s2232_s22 }
 0x151   : > { %952 = vrot.lane.b32.xlu0 %v3501_v24, %s2232_s22 }
 0x152   : > { %v1093_v47 = vpop.permute.xlu1 %1092  ;;  %1082 = vrot.lane.b32.xlu2 %v1021_v0, %s2235_s25 }
 0x153   : > { %v681_v39 = vpop.permute.xlu0 %680  ;;  %v1429_v31 = vsel %vm1399_vm13, %v1392_v13, %v1093_v47 }
 0x154   : > { %v3533_v55 = vpop.permute.xlu2 %820  ;;  %v1259_v0 = vsel %vm1251_vm10, %v1222_v17, %v681_v39  ;;  %v542_v39 = vrot.slane %v540_v44, 1  ;;  %v3975_v44 = vld [vmem:[#allocation17_spill] sm:$0xff] }
 0x155   : > { %v1296_v47 = vsel %vm1288_vm9, %v1259_v0, %v3451_v36 }
 0x156   : > { %v543_v12 = vsel %vm395_vm3, %v538_v49, %v542_v39 }
 0x158   : > { %1159 = vrot.lane.b32.xlu1 %v1124_v38, %s2236_s30 }
 0x159   : > { %1096 = vrot.lane.b32.xlu0 %v1054_v53, %s2235_s25  ;;  %v482_v53 = vor.u32 %v2979_v8, %v478_v46  ;;  %v293_v8 = vld [vmem:[%s2333_s18 + $0x98] sm:$0x1] }
 0x15a   : > { %v888_v45 = vpop.permute.xlu1 %887  ;;  %1173 = vrot.lane.b32.xlu2 %v1138_v32, %s2236_s30  ;;  %v294_v46 = vld [vmem:[%s2333_s18 + $0x98] sm:$0x3]  ;;  %v664_v19 = vunpack.c.l.b16 %v293_v8 }
 0x15b   : > { %v1170_v60 = vpop.permute.xlu0 %1169  ;;  %v1333_v38 = vsel %vm1325_vm11, %v1296_v47, %v888_v45  ;;  %v487_v9 = vsel %vm395_vm3, %v482_v53, %v3973_v6  ;;  %v3978_v6 = vld [vmem:[#allocation13_spill] sm:$0xff] }
 0x15c   : > { %v1466_v54 = vsel %vm1436_vm14, %v1429_v31, %v1170_v60  ;;  %v3556_v37 = vpop.permute.xlu2 %574  ;;  %v1370_v11 = vsel %vm1362_vm12, %v1333_v38, %v3473_v3  ;;  %v2157_v3 = vld [vmem:[%s2333_s18 + $0x40] sm:$0xff]  ;;  %v3976_v38 = vrot.slane %v3975_v44, 3 }
 0x15d   : > { %2009 = vmatmul.msk.bf16.gmra.mxu2 %vm1497_vm15, %v1466_v54  ;;  %v3974_v60 = vld [vmem:[#allocation21_spill] sm:$0xff]  ;;  %v619_v54 = vrot.slane %v394_v63, 1  ;;  %v667_v63 = vpack.c.b16 %v664_v19, %v664_v19 }
 0x15e   : > { %v1005_v23 = vsel %vm973_vm4, %v3387_v27, %v3974_v60 }
 0x15f   : > { %v620_v27 = vsel %vm583_vm0, %v3258_v25, %v619_v54  ;;  %v1116_v25 = vsel %vm1103_vm5, %v1113_v10, %v3976_v38 }
 0x160   : > { %631 = vrot.lane.b32.xlu1 %v3335_v16, %s2230_s20 }
 0x161   : > { %554 = vrot.lane.b32.xlu0 %v447_v62, %s2233_s23  ;;  %v711_v62 = vunpack.c.l.b16 %v294_v46 }
 0x162   : > { %v1071_v56 = vpop.permute.xlu1 %1070  ;;  %684 = vrot.lane.b32.xlu2 %v3970_v48, %s2229_s19 }
 0x163   : > { %v561_v2 = vpop.permute.xlu0 %560  ;;  %v712_v47 = vpack.c.b16 %v711_v62, %v711_v62 }
 0x164   : > { %v1158_v16 = vpop.permute.xlu2 %1157  ;;  %v1195_v31 = vsel %vm1177_vm7, %v2157_v3, %v561_v2 }
 0x165   : > { %v1232_v35 = vsel %vm1214_vm8, %v1195_v31, %v3503_v14 }
 0x168   : > { %891 = vrot.lane.b32.xlu1 %v3371_v20, %s2231_s21  ;;  %v1407_v20 = vsel %vm1399_vm13, %v1370_v11, %v1071_v56  ;;  %v672_v11 = vrot.slane %v667_v63, 1 }
 0x169   : > { %814 = vrot.lane.b32.xlu0 %v745_v51, %s2234_s24 }
 0x16a   : > { %v1552_v36 = vpop.f32.mrf.mxu0  ;;  %v691_v30 = vpop.permute.xlu1 %690  ;;  %944 = vrot.lane.b32.xlu2 %v3972_v15, %s2232_s22  ;;  %v673_v50 = vsel %vm583_vm0, %v670_v5, %v672_v11  ;;  %v300_v15 = vld [vmem:[%s2333_s18 + $0xa0] sm:$0x7]  ;;  %v879_v5 = vrot.slane %v712_v47, 2 }
 0x16b   : > { %v1148_v32 = vpop.permute.xlu0 %1147  ;;  %v1553_v45 = vadd.f32 %v3410_v43, %v1552_v36  ;;  %v1269_v0 = vsel %vm1251_vm10, %v1232_v35, %v691_v30  ;;  %v796_v36 = vshrl.u32 %v712_v47, 16  ;;  %v971_v46 = vunpack.c.l.b16 %v300_v15 }
 0x16c   : > { %v1444_v13 = vsel %vm1436_vm14, %v1407_v20, %v1148_v32  ;;  %v3594_v29 = vpop.permute.xlu2 %552  ;;  %v1306_v14 = vsel %vm1288_vm9, %v1269_v0, %v3533_v55  ;;  %v799_v55 = vshll.u32 %v712_v47, 16 }
 0x16d   : > { %1998 = vmatmul.msk.bf16.gmra.mxu0 %vm1497_vm15, %v1444_v13  ;;  %v1639_v56 = vmax.f32 %v1553_v45, 0.0  ;;  %v798_v30 = vrot.slane %v796_v36, 1  ;;  %v299_v13 = vld [vmem:[%s2333_s18 + $0xa0] sm:$0x3] }
 0x16e   : > { %v801_v32 = vrot.slane %v799_v55, 2  ;;  %v924_v8 = vunpack.c.l.b16 %v299_v13 }
 0x170   : > { %578 = vrot.lane.b32.xlu1 %v543_v12, %s2233_s23  ;;  %v3977_v12 = vld [vmem:[#allocation8_spill] sm:$0xff]  ;;  %v927_v60 = vpack.c.b16 %v924_v8, %v924_v8 }
 0x171   : > { %564 = vrot.lane.b32.xlu0 %v487_v9, %s2233_s23  ;;  %v802_v9 = vor.u32 %v801_v32, %v798_v30 }
 0x172   : > { %v1554_v52 = vpop.f32.mrf.mxu0  ;;  %v951_v59 = vpop.permute.xlu1 %950  ;;  %1074 = vrot.lane.b32.xlu2 %v1005_v23, %s2235_s25  ;;  %v972_v23 = vpack.c.b16 %v971_v46, %v971_v46 }
 0x173   : > { %v1555_v57 = vadd.f32 %v3410_v43, %v1554_v52  ;;  %v898_v17 = vpop.permute.xlu0 %897  ;;  %v803_v31 = vsel %vm713_vm2, %v3466_v61, %v802_v9  ;;  %v932_v52 = vrot.slane %v927_v60, 2 }
 0x174   : > { %v3613_v48 = vpop.permute.xlu2 %964  ;;  %v1343_v51 = vsel %vm1325_vm11, %v1306_v14, %v898_v17  ;;  %v1056_v54 = vshrl.u32 %v972_v23, 16  ;;  %v1059_v19 = vshll.u32 %v972_v23, 16  ;;  %v2158_v17 = vld [vmem:[%s2333_s18 + $0x78] sm:$0xff] }
 0x175   : > { %v1640_v2 = vmax.f32 %v1555_v57, 0.0  ;;  %v1380_v53 = vsel %vm1362_vm12, %v1343_v51, %v951_v59  ;;  %v933_v61 = vsel %vm843_vm1, %v930_v26, %v932_v52  ;;  %v1209_v0 = vsel %vm1177_vm7, %v2158_v17, %v3556_v37  ;;  %v2159_v37 = vld [vmem:[%s2333_s18 + $0x20] sm:$0xff] }
 0x176   : > { %v1058_v59 = vrot.slane %v1056_v54, 2  ;;  %v1139_v51 = vrot.slane %v972_v23, 3  ;;  %v1187_v44 = vsel %vm1177_vm7, %v2159_v37, %v3594_v29  ;;  %v2160_v23 = vld [vmem:[%s2333_s18 + $0x48] sm:$0xff] }
 0x177   : > { %v3617_v7 = vpack.c.bf16 %v1640_v2, %v1639_v56  ;;  %v3980_v56 = vld [vmem:[#allocation14_spill] sm:$0xff] }
 0x178   : > { %655 = vrot.lane.b32.xlu1 %v620_v27, %s2230_s20  ;;  %v1025_v2 = vsel %vm973_vm4, %v3490_v28, %v3980_v56  ;;  %v1140_v40 = vsel %vm1103_vm5, %v1137_v21, %v1139_v51 }
 0x179   : > { %641 = vrot.lane.b32.xlu0 %v3449_v18, %s2230_s20  ;;  %s2185_s20 = scalar_lea.hbm %s3853_s7, 2 }
 0x17a   : > { %v652_v49 = vpop.permute.xlu1 %651  ;;  %1151 = vrot.lane.b32.xlu2 %v1116_v25, %s2236_s30  ;;  %v3981_v25 = vld [vmem:[#allocation7_spill] sm:$0xff] }
 0x17b   : > { %v1081_v39 = vpop.permute.xlu0 %1080  ;;  %v1246_v27 = vsel %vm1214_vm8, %v1209_v0, %v652_v49  ;;  %v3982_v11 = vrot.slane %v3981_v25, 3 }
 0x17c   : > { %v1417_v20 = vsel %vm1399_vm13, %v1380_v53, %v1081_v39  ;;  %v813_v10 = vpop.permute.xlu2 %812 }
 0x17d   : > { %v1454_v18 = vsel %vm1436_vm14, %v1417_v20, %v1158_v16  ;;  %v765_v16 = vsel %vm713_vm2, %v3441_v41, %v3978_v6  ;;  %v880_v41 = vsel %vm843_vm1, %v3294_v33, %v879_v5  ;;  %v3979_v33 = vld [vmem:[#allocation11_spill] sm:$0xff]  ;;  %v1126_v28 = vsel %vm1103_vm5, %v1123_v58, %v3982_v11 }
 0x17e   : > { %2003 = vmatmul.msk.bf16.gmra.mxu1 %vm1497_vm15, %v1454_v18 }
 0x180   : > { %708 = vrot.lane.b32.xlu1 %v673_v50, %s2229_s19 }
 0x181   : > { %694 = vrot.lane.b32.xlu0 %v3977_v12, %s2229_s19  ;;  %v1577_v12 = vpop.f32.mrf.mxu1 }
 0x182   : > { %v835_v34 = vpop.permute.xlu1 %834  ;;  %824 = vrot.lane.b32.xlu2 %v765_v16, %s2234_s24 }
 0x183   : > { %v705_v3 = vpop.permute.xlu0 %704 }
 0x184   : > { %v943_v45 = vpop.permute.xlu2 %942  ;;  %v1283_v63 = vsel %vm1251_vm10, %v1246_v27, %v705_v3 }
 0x185   : > { %v1320_v38 = vsel %vm1288_vm9, %v1283_v63, %v835_v34 }
 0x188   : > { %901 = vrot.lane.b32.xlu1 %v3501_v24, %s2231_s21  ;;  %v1061_v24 = vrot.slane %v1059_v19, 3 }
 0x189   : > { %838 = vrot.lane.b32.xlu0 %v803_v31, %s2234_s24  ;;  %v1579_v34 = vpop.f32.mrf.mxu1 }
 0x18a   : > { %v630_v62 = vpop.permute.xlu1 %629  ;;  %915 = vrot.lane.b32.xlu2 %v880_v41, %s2231_s21  ;;  %v1062_v26 = vor.u32 %v1061_v24, %v1058_v59  ;;  %v1580_v24 = vadd.f32 %v3410_v43, %v1579_v34  ;;  %s1829_s21 = sld [smem:[#allocation3]] }
 0x18b   : > { %v912_v35 = vpop.permute.xlu0 %911  ;;  %v1224_v49 = vsel %vm1214_vm8, %v1187_v44, %v630_v62 }
 0x18c   : > { %v1073_v57 = vpop.permute.xlu2 %1072  ;;  %v1063_v36 = vsel %vm973_vm4, %v3519_v1, %v1062_v26  ;;  %v1357_v39 = vsel %vm1325_vm11, %v1320_v38, %v912_v35  ;;  %v1650_v37 = vmax.f32 %v1580_v24, 0.0 }
 0x18d   : > { %v1394_v58 = vsel %vm1362_vm12, %v1357_v39, %v3613_v48 }
 0x190   : > { %968 = vrot.lane.b32.xlu1 %v933_v61, %s2232_s22  ;;  %v2161_v61 = vld [vmem:[%s2333_s18 + $0x80] sm:$0xff] }
 0x191   : > { %954 = vrot.lane.b32.xlu0 %v3979_v33, %s2232_s22  ;;  %v1578_v33 = vadd.f32 %v3410_v43, %v1577_v12  ;;  %s244_s22 = sand.u32 1, %s2219_s27  }
 0x192   : > { %v1095_v47 = vpop.permute.xlu1 %1094  ;;  %1084 = vrot.lane.b32.xlu2 %v1025_v2, %s2235_s25  ;;  %s245_s15 = scalar_lea.vmem [#allocation4], %s244_s22  ;;  %s1847_s9 = scalar_lea.sflag [#allocation5], %s244_s22 }
 0x193   : > { %v683_v14 = vpop.permute.xlu0 %682  ;;  %v1431_v1 = vsel %vm1399_vm13, %v1394_v58, %v1095_v47  ;;  %v1649_v25 = vmax.f32 %v1578_v33, 0.0  ;;  %s1857_s16 = sshll.u32 %s245_s15, 4  ;;  %s1858_s16 = int_to_ptr.vmem [resolvable:$true] %s1857_s16 }
 0x194   : > { %v1150_v55 = vpop.permute.xlu2 %1149  ;;  %v1261_v53 = vsel %vm1251_vm10, %v1224_v49, %v683_v14 }
 0x195   : > { %v1298_v20 = vsel %vm1288_vm9, %v1261_v53, %v813_v10 }
 0x198   : > { %1161 = vrot.lane.b32.xlu1 %v1126_v28, %s2236_s30 }
 0x199   : > { %1098 = vrot.lane.b32.xlu0 %v1063_v36, %s2235_s25 }
 0x19a   : > { %v890_v29 = vpop.permute.xlu1 %889  ;;  %1175 = vrot.lane.b32.xlu2 %v1140_v40, %s2236_s30  ;;  %v1680_v40 = vpack.c.bf16 %v1650_v37, %v1649_v25 }
 0x19b   : > { %v1172_v18 = vpop.permute.xlu0 %1171  ;;  %v1335_v50 = vsel %vm1325_vm11, %v1298_v20, %v890_v29  ;;  %v2162_v20 = vld [vmem:[%s2333_s18 + $0x28] sm:$0xff] }
 0x19c   : > { %v1468_v30 = vsel %vm1436_vm14, %v1431_v1, %v1172_v18  ;;  %v1372_v32 = vsel %vm1362_vm12, %v1335_v50, %v943_v45  ;;  %v823_v21 = vpop.permute.xlu2 %822 }
 0x19d   : > { %2010 = vmatmul.msk.bf16.gmra.mxu2 %vm1497_vm15, %v1468_v30  ;;  %v1409_v42 = vsel %vm1399_vm13, %v1372_v32, %v1073_v57 }
 0x19e   : > { %v1446_v48 = vsel %vm1436_vm14, %v1409_v42, %v1150_v55 }
 0x19f   : > { %1999 = vmatmul.msk.bf16.gmra.mxu0 %vm1497_vm15, %v1446_v48 }
 0x1a2   : > { %v577_v10 = vpop.permute.xlu1 %576 }
 0x1a3   : > { %v563_v13 = vpop.permute.xlu0 %562  ;;  %v1211_v57 = vsel %vm1177_vm7, %v2161_v61, %v577_v10 }
 0x1a4   : > { %v914_v15 = vpop.permute.xlu2 %913  ;;  %v1197_v41 = vsel %vm1177_vm7, %v2160_v23, %v563_v13 }
 0x1aa   : > { %v654_v6 = vpop.permute.xlu1 %653 }
 0x1ab   : > { %v640_v16 = vpop.permute.xlu0 %639  ;;  %v1248_v17 = vsel %vm1214_vm8, %v1211_v57, %v654_v6 }
 0x1ac   : > { %v1083_v9 = vpop.permute.xlu2 %1082  ;;  %v1234_v52 = vsel %vm1214_vm8, %v1197_v41, %v640_v16 }
 0x1b2   : > { %v707_v8 = vpop.permute.xlu1 %706 }
 0x1b3   : > { %v693_v46 = vpop.permute.xlu0 %692  ;;  %v1285_v56 = vsel %vm1251_vm10, %v1248_v17, %v707_v8 }
 0x1b4   : > { %v1174_v3 = vpop.permute.xlu2 %1173  ;;  %v1271_v54 = vsel %vm1251_vm10, %v1234_v52, %v693_v46 }
 0x1b5   : > { %v1308_v2 = vsel %vm1288_vm9, %v1271_v54, %v823_v21  ;;  %v2163_v54 = vld [vmem:[%s2333_s18 + $0x50] sm:$0xff] }
 0x1ba   : > { %v900_v5 = vpop.permute.xlu1 %899 }
 0x1bb   : > { %v837_v31 = vpop.permute.xlu0 %836  ;;  %v1582_v45 = vpop.f32.mrf.mxu1  ;;  %v1345_v27 = vsel %vm1325_vm11, %v1308_v2, %v900_v5 }
 0x1bc   : > { %v685_v60 = vpop.permute.xlu2 %684  ;;  %v1583_v19 = vadd.f32 %v3410_v43, %v1582_v45  ;;  %v1322_v26 = vsel %vm1288_vm9, %v1285_v56, %v837_v31 }
 0x1bd   : > { %v1359_v38 = vsel %vm1325_vm11, %v1322_v26, %v914_v15 }
 0x1be   : > { %v1651_v63 = vmax.f32 %v1583_v19, 0.0 }
 0x1c2   : > { %v967_v62 = vpop.permute.xlu1 %966 }
 0x1c3   : > { %v953_v35 = vpop.permute.xlu0 %952  ;;  %v1584_v59 = vpop.f32.mrf.mxu1  ;;  %v1396_v11 = vsel %vm1362_vm12, %v1359_v38, %v967_v62 }
 0x1c4   : > { %v1585_v0 = vadd.f32 %v3410_v43, %v1584_v59  ;;  %v1382_v14 = vsel %vm1362_vm12, %v1345_v27, %v953_v35  ;;  %v945_v51 = vpop.permute.xlu2 %944  ;;  %v2164_v59 = vld [vmem:[%s2333_s18 + $0x88] sm:$0xff]  ;;  %s2181_s18 = scalar_lea.hbm %s2180_s10, 1 }
 0x1c5   : > { %v1419_v55 = vsel %vm1399_vm13, %v1382_v14, %v1083_v9  ;;  %v1607_v9 = vpop.f32.mrf.mxu2  ;;  %p2182_p11 = scmp.ne.s32.totalorder %s2180_s10, %s2181_s18  ;;  %p2187_p1 = scmp.lt.s32.totalorder %s2185_s20, %s2181_s18 }
 0x1c6   : > { %v1652_v47 = vmax.f32 %v1585_v0, 0.0 }
 0x1c7   : > { %p2183_p12 = pnand %p2182_p11, %p2318_p5  ;;  %p2188_p2 = por %p2187_p1, %p2186_p0 }
 0x1c8   : > { %v1681_v44 = vpack.c.bf16 %v1652_v47, %v1651_v63 }
 0x1c9   : > { %p2184_p13 = pneg %p2183_p12 }
 0x1ca   : > { %1701 = vmatpush.bf16.msrb.mxu1 %v1681_v44  ;;  %v1160_v28 = vpop.permute.xlu1 %1159 }
 0x1cb   : > { %v1097_v36 = vpop.permute.xlu0 %1096  ;;  %v1456_v39 = vsel %vm1436_vm14, %v1419_v55, %v1160_v28  ;;  %p2189_p3 = pnand %p2188_p2, %p2184_p13 }
 0x1cc   : > { %v1433_v49 = vsel %vm1399_vm13, %v1396_v11, %v1097_v36  ;;  %2004 = vmatmul.msk.bf16.gmra.mxu1 %vm1497_vm15, %v1456_v39  ;;  %v1075_v58 = vpop.permute.xlu2 %1074  ;;  %v1557_v39 = vpop.f32.mrf.mxu0 }
 0x1cd   : > { %v1470_v53 = vsel %vm1436_vm14, %v1433_v49, %v1174_v3  ;;  %v1609_v31 = vpop.f32.mrf.mxu2 }
 0x1ce   : > { %2011 = vmatmul.msk.bf16.vlgmr.msra.gmra.mxu3 %vm1497_vm15, %v1470_v53  ;;  %1702 = vmatpush.bf16.msrb.mxu1 %v1680_v40 }
 0x1d2   : > { %v632_v1 = vpop.permute.xlu1 %631 }
 0x1d3   : > { %v555_v29 = vpop.permute.xlu0 %554 }
 0x1d4   : > { %v1189_v18 = vsel %vm1177_vm7, %v2162_v20, %v555_v29  ;;  %v1152_v10 = vpop.permute.xlu2 %1151 }
 0x1d5   : > { %v1226_v50 = vsel %vm1214_vm8, %v1189_v18, %v632_v1  ;;  %v1612_v41 = vpop.f32.mrf.mxu2 }
 0x1d6   : > { %v1263_v42 = vsel %vm1251_vm10, %v1226_v50, %v685_v60 }
 0x1da   : > { %v892_v30 = vpop.permute.xlu1 %891 }
 0x1db   : > { %v815_v32 = vpop.permute.xlu0 %814 }
 0x1dc   : > { %v1300_v21 = vsel %vm1288_vm9, %v1263_v42, %v815_v32  ;;  %v825_v34 = vpop.permute.xlu2 %824  ;;  %v1613_v32 = vadd.f32 %v3410_v43, %v1612_v41 }
 0x1dd   : > { %v1337_v48 = vsel %vm1325_vm11, %v1300_v21, %v892_v30  ;;  %v1614_v0 = vpop.f32.mrf.mxu2  ;;  %v1610_v21 = vadd.f32 %v3410_v43, %v1609_v31 }
 0x1de   : > { %v1374_v13 = vsel %vm1362_vm12, %v1337_v48, %v945_v51  ;;  %v1615_v18 = vadd.f32 %v3410_v43, %v1614_v0 }
 0x1df   : > { %v1411_v15 = vsel %vm1399_vm13, %v1374_v13, %v1075_v58  ;;  %v1559_v13 = vpop.f32.mrf.mxu0 }
 0x1e0   : > { %v1448_v12 = vsel %vm1436_vm14, %v1411_v15, %v1152_v10  ;;  %v1664_v48 = vmax.f32 %v1615_v18, 0.0  ;;  %v1608_v15 = vadd.f32 %v3410_v43, %v1607_v9 }
 0x1e1   : > { %2000 = vmatmul.msk.bf16.gmra.mxu0 %vm1497_vm15, %v1448_v12  ;;  %v1663_v12 = vmax.f32 %v1613_v32, 0.0 }
 0x1e2   : > { %v579_v6 = vpop.permute.xlu1 %578 }
 0x1e3   : > { %v565_v16 = vpop.permute.xlu0 %564  ;;  %v1213_v24 = vsel %vm1177_vm7, %v2164_v59, %v579_v6  ;;  %v1662_v6 = vmax.f32 %v1610_v21, 0.0 }
 0x1e4   : > { %v916_v45 = vpop.permute.xlu2 %915  ;;  %v1199_v19 = vsel %vm1177_vm7, %v2163_v54, %v565_v16  ;;  %v1687_v16 = vpack.c.bf16 %v1664_v48, %v1663_v12 }
 0x1e5   : > { %v1617_v28 = vpop.f32.mrf.mxu2 }
 0x1e6   : > { %v1618_v1 = vadd.f32 %v3410_v43, %v1617_v28 }
 0x1e8   : > { %v1665_v42 = vmax.f32 %v1618_v1, 0.0 }
 0x1ea   : > { %v656_v8 = vpop.permute.xlu1 %655 }
 0x1eb   : > { %v642_v46 = vpop.permute.xlu0 %641  ;;  %v1250_v17 = vsel %vm1214_vm8, %v1213_v24, %v656_v8  ;;  %v1661_v8 = vmax.f32 %v1608_v15, 0.0  ;;  %v1560_v24 = vadd.f32 %v3410_v43, %v1559_v13 }
 0x1ec   : > { %v1085_v52 = vpop.permute.xlu2 %1084  ;;  %v1236_v62 = vsel %vm1214_vm8, %v1199_v19, %v642_v46 }
 0x1ed   : > { %v1619_v36 = vpop.f32.mrf.mxu2  ;;  %v1686_v46 = vpack.c.bf16 %v1662_v6, %v1661_v8 }
 0x1ee   : > { %v1620_v40 = vadd.f32 %v3410_v43, %v1619_v36 }
 0x1f0   : > { %v1666_v50 = vmax.f32 %v1620_v40, 0.0 }
 0x1f2   : > { %v709_v3 = vpop.permute.xlu1 %708  ;;  %v1688_v10 = vpack.c.bf16 %v1666_v50, %v1665_v42 }
 0x1f3   : > { %v695_v5 = vpop.permute.xlu0 %694  ;;  %v1287_v33 = vsel %vm1251_vm10, %v1250_v17, %v709_v3 }
 0x1f4   : > { %v1273_v35 = vsel %vm1251_vm10, %v1236_v62, %v695_v5  ;;  %v1176_v47 = vpop.permute.xlu2 %1175 }
 0x1f5   : > { %v1310_v56 = vsel %vm1288_vm9, %v1273_v35, %v825_v34  ;;  %v1562_v34 = vpop.f32.mrf.mxu0 }
 0x1fa   : > { %v902_v60 = vpop.permute.xlu1 %901 }
 0x1fb   : > { %v839_v23 = vpop.permute.xlu0 %838  ;;  %v1347_v2 = vsel %vm1325_vm11, %v1310_v56, %v902_v60  ;;  %v1558_v56 = vadd.f32 %v3410_v43, %v1557_v39 }
 0x1fc   : > { %v1324_v27 = vsel %vm1288_vm9, %v1287_v33, %v839_v23  ;;  %v1587_v23 = vpop.f32.mrf.mxu1 }
 0x1fd   : > { %v1361_v63 = vsel %vm1325_vm11, %v1324_v27, %v916_v45  ;;  %v1564_v3 = vpop.f32.mrf.mxu0  ;;  %v1642_v27 = vmax.f32 %v1560_v24, 0.0  ;;  %v1820_v24 = vlaneseq }
 0x1fe   : > { %v1565_v35 = vadd.f32 %v3410_v43, %v1564_v3 }
 0x200   : > { %v1644_v17 = vmax.f32 %v1565_v35, 0.0 }
 0x202   : > { %v969_v61 = vpop.permute.xlu1 %968 }
 0x203   : > { %v955_v57 = vpop.permute.xlu0 %954  ;;  %v1398_v14 = vsel %vm1362_vm12, %v1361_v63, %v969_v61  ;;  %v1641_v63 = vmax.f32 %v1558_v56, 0.0  ;;  %v1825_v56 = vand.u32 127, %v1820_v24 }
 0x204   : > { %v1384_v26 = vsel %vm1362_vm12, %v1347_v2, %v955_v57  ;;  %v1563_v57 = vadd.f32 %v3410_v43, %v1562_v34  ;;  %v1589_v33 = vpop.f32.mrf.mxu1  ;;  %v2075_v34 = vld [vmem:[%s3851_s5 + $0x38] sm:$0xff] }
 0x205   : > { %v1421_v51 = vsel %vm1399_vm13, %v1384_v26, %v1085_v52 }
 0x206   : > { %v1643_v2 = vmax.f32 %v1563_v57, 0.0 }
 0x208   : > { %v1677_v26 = vpack.c.bf16 %v1644_v17, %v1643_v2  ;;  %v1821_v17 = vshrl.u32 %v1820_v24, 7 }
 0x20a   : > { %v1162_v37 = vpop.permute.xlu1 %1161 }
 0x20b   : > { %v1099_v44 = vpop.permute.xlu0 %1098  ;;  %v1458_v25 = vsel %vm1436_vm14, %v1421_v51, %v1162_v37  ;;  %v1673_v51 = vld [vmem:[%s3848_s2] sm:$0x7] }
 0x20c   : > { %v1435_v38 = vsel %vm1399_vm13, %v1398_v14, %v1099_v44  ;;  %2005 = vmatmul.msk.bf16.gmra.mxu1 %vm1497_vm15, %v1458_v25  ;;  %1693 = vst [vmem:[#allocation1] ss:$9 sm:$0xff] %v1673_v51 }
 0x20d   : > { %v1472_v11 = vsel %vm1436_vm14, %v1435_v38, %v1176_v47  ;;  %v1676_v47 = vpack.c.bf16 %v1642_v27, %v1641_v63  ;;  %v1830_v63 = vstv %s1829_s21 }
 0x20e   : > { %2012 = vmatmul.msk.bf16.gmra.mxu3 %vm1497_vm15, %v1472_v11 }
 0x213   : > { %v1694_v38 = vld [vmem:[#allocation1] sm:$0xff] }
 0x21c   : > { %v1567_v5 = vpop.f32.mrf.mxu0 }
 0x21d   : > { %v1568_v54 = vadd.f32 %v3410_v43, %v1567_v5  ;;  %v1696_v5 = vld [vmem:[#allocation1 + $0x12] sm:$0xff] }
 0x21f   : > { %v1645_v59 = vmax.f32 %v1568_v54, 0.0  ;;  %v2068_v54 = vld [vmem:[%s3851_s5] sm:$0xff] }
 0x220   : > { %v1622_v55 = vpop.f32.mrf.mxu2 }
 0x221   : > { %v1623_v49 = vadd.f32 %v3410_v43, %v1622_v55 }
 0x223   : > { %v1667_v29 = vmax.f32 %v1623_v49, 0.0 }
 0x224   : > { %v1569_v45 = vpop.f32.mrf.mxu0 }
 0x225   : > { %v1570_v9 = vadd.f32 %v3410_v43, %v1569_v45  ;;  %v2073_v45 = vld [vmem:[%s3851_s5 + $0x28] sm:$0xff] }
 0x227   : > { %v1646_v61 = vmax.f32 %v1570_v9, 0.0  ;;  %v2069_v9 = vld [vmem:[%s3851_s5 + $0x8] sm:$0xff] }
 0x228   : > { %v1624_v53 = vpop.f32.mrf.mxu2 }
 0x229   : > { %v1625_v58 = vadd.f32 %v3410_v43, %v1624_v53  ;;  %v1678_v0 = vpack.c.bf16 %v1646_v61, %v1645_v59 }
 0x22b   : > { %v1668_v20 = vmax.f32 %v1625_v58, 0.0  ;;  %v1590_v58 = vadd.f32 %v3410_v43, %v1589_v33 }
 0x22d   : > { %v1689_v30 = vpack.c.bf16 %v1668_v20, %v1667_v29  ;;  %v1588_v20 = vadd.f32 %v3410_v43, %v1587_v23  ;;  %v1654_v42 = vmax.f32 %v1590_v58, 0.0  ;;  %v2070_v23 = vld [vmem:[%s3851_s5 + $0x10] sm:$0xff] }
 0x22f   : > { %1714 = vmatpush.bf16.msrb.mxu2 %v1689_v30  ;;  %v1653_v15 = vmax.f32 %v1588_v20, 0.0 }
 0x233   : > { %1715 = vmatpush.bf16.msrb.mxu2 %v1688_v10 }
 0x237   : > { %1716 = vmatpush.bf16.msrb.mxu2 %v1687_v16  ;;  %v1682_v16 = vpack.c.bf16 %v1654_v42, %v1653_v15 }
 0x23b   : > { %1717 = vmatpush.bf16.msrb.mxu2 %v1686_v46  ;;  %v1695_v46 = vld [vmem:[#allocation1 + $0x9] sm:$0xff] }
 0x23f   : > { %1718 = vmatpush.bf16.msrb.mxu2 %v3457_v22 }
 0x249   : > { %v1592_v14 = vpop.f32.mrf.mxu1 }
 0x24a   : > { %v1593_v53 = vadd.f32 %v3410_v43, %v1592_v14 }
 0x24c   : > { %v1655_v18 = vmax.f32 %v1593_v53, 0.0 }
 0x251   : > { %v1627_v37 = vpop.f32.mrf.mxu3  ;;  %v1594_v44 = vpop.f32.mrf.mxu1 }
 0x252   : > { %v1595_v49 = vadd.f32 %v3410_v43, %v1594_v44  ;;  %v1628_v48 = vadd.f32 %v3410_v43, %v1627_v37 }
 0x254   : > { %v1669_v8 = vmax.f32 %v1628_v48, 0.0 }
 0x259   : > { %v1629_v25 = vpop.f32.mrf.mxu3 }
 0x25a   : > { %v1630_v30 = vadd.f32 %v3410_v43, %v1629_v25 }
 0x25c   : > { %v1670_v12 = vmax.f32 %v1630_v30, 0.0 }
 0x25e   : > { %v1572_v31 = vpop.f32.mrf.mxu0  ;;  %v1690_v3 = vpack.c.bf16 %v1670_v12, %v1669_v8 }
 0x25f   : > { %v1573_v60 = vadd.f32 %v3410_v43, %v1572_v31  ;;  %v2072_v31 = vld [vmem:[%s3851_s5 + $0x20] sm:$0xff] }
 0x261   : > { %v1647_v19 = vmax.f32 %v1573_v60, 0.0  ;;  %v2071_v60 = vld [vmem:[%s3851_s5 + $0x18] sm:$0xff] }
 0x266   : > { %v1574_v41 = vpop.f32.mrf.mxu0 }
 0x267   : > { %v1575_v52 = vadd.f32 %v3410_v43, %v1574_v41 }
 0x269   : > { %v1648_v62 = vmax.f32 %v1575_v52, 0.0 }
 0x26b   : > { %v1679_v22 = vpack.c.bf16 %v1648_v62, %v1647_v19 }
 0x26d   : > { %1703 = vmatpush.bf16.msrb.mxu1 %v1679_v22 }
 0x271   : > { %1704 = vmatpush.bf16.msrb.mxu1 %v1678_v0  ;;  %v1822_v0 = vstv %s2301_s0 }
 0x272   : > { %v1823_v33 = vadd.s32 %v1822_v0, %v1821_v17 }
 0x274   : > { %v1826_v2 = vmul.u32 128, %v1823_v33 }
 0x275   : > { %1705 = vmatpush.bf16.msrb.mxu1 %v1677_v26 }
 0x276   : > { %v1827_v27 = vadd.s32 %v1826_v2, %v1825_v56 }
 0x278   : > { %v1828_v26 = vmul.u32 2654435761, %v1827_v27 }
 0x279   : > { %1706 = vmatpush.bf16.msrb.mxu1 %v1676_v47 }
 0x27a   : > { %v1831_v47 = vadd.s32 %v1830_v63, %v1828_v26 }
 0x27c   : > { %v1832_v14 = vshrl.u32 %v1831_v47, 16 }
 0x27d   : > { %1707 = vmatpush.bf16.msrb.mxu1 %v3617_v7 }
 0x27e   : > { %v1833_v51 = vxor.u32 %v1832_v14, %v1831_v47 }
 0x280   : > { %v1834_v37 = vmul.u32 2246822507, %v1833_v51 }
 0x281   : > { %1708 = vmatpush.bf16.msrb.mxu1 %v3478_v4  ;;  %v1656_v4 = vmax.f32 %v1595_v49, 0.0 }
 0x282   : > { %v1835_v44 = vshrl.u32 %v1834_v37, 13 }
 0x283   : > { %v1683_v21 = vpack.c.bf16 %v1656_v4, %v1655_v18 }
 0x284   : > { %1709 = vmatmul.bf16.vlgmr.msrb.gmra.mxu1 %v1694_v38  ;;  %v1836_v38 = vxor.u32 %v1835_v44, %v1834_v37 }
 0x286   : > { %v1837_v25 = vmul.u32 3266489909, %v1836_v38 }
 0x289   : > { %v1597_v11 = vpop.f32.mrf.mxu1 }
 0x28a   : > { %v1598_v28 = vadd.f32 %v3410_v43, %v1597_v11  ;;  %v1838_v11 = vshrl.u32 %v1837_v25, 16 }
 0x28c   : > { %v1657_v40 = vmax.f32 %v1598_v28, 0.0  ;;  %v1839_v28 = vxor.u32 %v1838_v11, %v1837_v25 }
 0x28e   : > { %v2046_v49 = vxor.u32 2147483648, %v1839_v28 }
 0x290   : > { %vm1842_vm0 = vcmp.ge.s32.totalorder %v2046_v49, 0 }
 0x291   : > { %v1632_v36 = vpop.f32.mrf.mxu3  ;;  %v1599_v55 = vpop.f32.mrf.mxu1 }
 0x292   : > { %v1600_v39 = vadd.f32 %v3410_v43, %v1599_v55  ;;  %v1633_v29 = vadd.f32 %v3410_v43, %v1632_v36  ;;  %v1757_v36 = vld [vmem:[%s3852_s6] sm:$0x1] }
 0x294   : > { %v1658_v7 = vmax.f32 %v1600_v39, 0.0  ;;  %v1671_v10 = vmax.f32 %v1633_v29, 0.0 }
 0x296   : > { %v1684_v1 = vpack.c.bf16 %v1658_v7, %v1657_v40 }
 0x298   : > { %1719 = vmatpush.bf16.msrb.mxu2 %v1684_v1 }
 0x299   : > { %v1634_v50 = vpop.f32.mrf.mxu3 }
 0x29a   : > { %v1635_v32 = vadd.f32 %v3410_v43, %v1634_v50  ;;  %v2074_v43 = vld [vmem:[%s3851_s5 + $0x30] sm:$0xff] }
 0x29c   : > { %v1672_v13 = vmax.f32 %v1635_v32, 0.0  ;;  %1720 = vmatpush.bf16.msrb.mxu2 %v1683_v21 }
 0x29e   : > { %v1691_v6 = vpack.c.bf16 %v1672_v13, %v1671_v10 }
 0x2a0   : > { %1733 = vmatpush.bf16.msrb.mxu3 %v1691_v6  ;;  %1721 = vmatpush.bf16.msrb.mxu2 %v1682_v16 }
 0x2a3   : > { %1722 = vmatmul.bf16.vlgmr.msrb.gmra.mxu2 %v1695_v46 }
 0x2a4   : > { %1734 = vmatpush.bf16.msrb.mxu3 %v1690_v3 }
 0x2a7   : > { %2013 = vmatmul.msk.bf16.vlgmr.msrb.gmra.mxu3 %vm1436_vm14, %v1696_v5 }
 0x2a8   : > { %1806 = vmatpush.bf16.msra.mxu3 %v2075_v34 }
 0x2ac   : > { %1807 = vmatpush.bf16.msra.mxu3 %v2074_v43 }
 0x2b0   : > { %1808 = vmatpush.bf16.msra.mxu3 %v2073_v45 }
 0x2b4   : > { %1809 = vmatpush.bf16.msra.mxu3 %v2072_v31 }
 0x2b8   : > { %1810 = vmatpush.bf16.msra.mxu3 %v2071_v60 }
 0x2bc   : > { %1811 = vmatpush.bf16.msra.mxu3 %v2070_v23 }
 0x2c0   : > { %1812 = vmatpush.bf16.msra.mxu3 %v2069_v9 }
 0x2c4   : > { %1813 = vmatpush.bf16.msra.mxu3 %v2068_v54 }
 0x301   : > { %v1710_v41 = vpop.f32.mrf.mxu1 }
 0x309   : > { %v1712_v52 = vpop.f32.mrf.mxu1 }
 0x326   : > { %v1723_v19 = vpop.f32.mrf.mxu2 }
 0x327   : > { %v1724_v62 = vadd.f32 %v1723_v19, %v1710_v41 }
 0x32a   : > { %v1736_v35 = vpop.f32.mrf.mxu3 }
 0x32b   : > { %v1737_v61 = vadd.f32 %v1736_v35, %v1724_v62 }
 0x32d   : > { %v1740_v22 = vpack.c.bf16 %v1737_v61, %v1737_v61 }
 0x32e   : > { %v1725_v57 = vpop.f32.mrf.mxu2 }
 0x32f   : > { %1814 = vmatmul.bf16.vlgmr.msra.gmra.mxu3 %v1740_v22 }
 0x332   : > { %v1738_v59 = vpop.f32.mrf.mxu3 }
 0x3b2   : > { %v1815_v55 = vpop.f32.mrf.mxu3 }
 0x3b3   : > { %v1816_v39 = vadd.f32 %v1815_v55, %v1757_v36 }
 0x3b5   : > { %v1819_v53 = vmax.f32 %v1816_v39, 0.0 }
 0x3b7   : > { %v1843_v40 = vmul.f32 2.0, %v1819_v53 }
 0x3b9   : > { %v1844_v7 = vsel %vm1842_vm0, %v1843_v40, 0.0 }
 0x3ba   : > { %v1817_v58 = vpop.f32.mrf.mxu3  ;;  %1845 = vst [vmem:[%s245_s15] sm:$0x1] %v1844_v7 }
 0x3bb   : > { %2192 = shalt.err (!%p2189_p3)
}
 0x3bc   : > { %2103 = dma.vmem_to_hbm [thread:$0]  (%p2318_p5), %s1858_s16, 16, %s1860_s17, %s1847_s9  }
 0x3bd PF: > { %p2109_p4 = scmp.ge.s32.totalorder %s2227_s29, 2  ;;  %s1871_s22 = sand.u32 1, %s2215_s26  }
 0x3be   : > { %s1872_s24 = scalar_lea.sflag [#allocation5], %s1871_s22 }
 0x3bf   : > { %p2106_p7 = pnand %p2109_p4, %p2322_p6 }
 0x3c1   : > { %p2107_p8 = pneg %p2106_p7 }
 0x3c3   : > { %2210 = dma.done.wait (%p2107_p8), %s1872_s24, 16  }
 0x3c4   : > { %2212 = vsyncadd (%p2107_p8), %s1872_s24, 4294967280  ;;  %p18_p9 = scmp.ge.s32.totalorder %s2305_s8, 4   ;;  %s3983_s26 = smov %s2219_s27 }
 0x3c5   : > { %s3984_s27 = smov %s2223_s28  ;;  %s3985_s28 = smov %s2316_s11 }
 0x3c6   : > { %s3986_s29 = smov %s2305_s8  ;;  %20 = sbr.rel (!%p18_p9) target bundleno = 5 (0x5), region = 79 }
 0x3cb   :  { %1877 = vsyncpa [#allocation5], 1 }
 0x3cc   :  { %1879 = vsyncpa [#allocation5 + $0x1], 1 }

</bundles_post_ra>
